<compile_context>
chip_gen: v5e
topology: v5e:2x2
jax: 0.10.0
libtpu: 0.0.40
codegen_flags: <defaults>
</compile_context>

<pallas_src>
import math

import jax
import jax.numpy as jnp
from jax.experimental import pallas as pl
from jax.experimental.pallas import tpu as pltpu

IMG_SIZE = 32          # hard-coded in the PyTorch module (col reset condition)

# ----------------------- configuration (consistent with the module) -----------------------
R           = 8                               # adapter bottleneck
EMBED       = 64                              # embedding_dim
PATCH       = 8                               # patch_size
CHANNEL     = 3                               # in channels
PATCH_DIM   = 1 * CHANNEL * PATCH * PATCH     # Flatten(1) of (B,1,C,P,P) -> 192
NUM_PATCH   = (IMG_SIZE // PATCH) ** 2        # 16
NUM_HEAD    = 4
DIM_HEAD    = EMBED // NUM_HEAD               # 16
NUM_CLASSES = 10
SEQ         = NUM_PATCH + 1                   # 17
BATCH       = 2
NUM_BLOCKS  = 12
EPS         = 1e-6                            # nn.LayerNorm(..., eps=1e-06)

# ---- packed per-layer "small params" blob layout: (NUM_BLOCKS, SP_ROWS, SP_COLS) f32 ----
SP_COLS = 4 * EMBED                            # 256 (widest bias: fc1)
SP_ROWS = 16                                   # 11 rows used, padded to a sublane multiple
(ROW_LN1_G, ROW_LN1_B, ROW_BQKV, ROW_BA1A, ROW_BA2A,
 ROW_LN2_G, ROW_LN2_B, ROW_BFC1, ROW_BFC2, ROW_BA1M, ROW_BA2M) = range(11)


# ----------------------------- in-kernel helpers -----------------------------
def _layernorm(x, g, b):
    mu  = jnp.mean(x, axis=-1, keepdims=True)
    var = jnp.mean(jnp.square(x - mu), axis=-1, keepdims=True)
    return (x - mu) * jax.lax.rsqrt(var + EPS) * g + b


def _gelu_exact(x):
    # nn.GELU() default is the exact (erf) formulation.
    return 0.5 * x * (1.0 + jax.lax.erf(x * (1.0 / math.sqrt(2.0))))


def _softmax_lastdim(x):
    m = jnp.max(x, axis=-1, keepdims=True)
    e = jnp.exp(x - m)
    # approx reciprocal rides the EUP slot; deviation from exact f32 softmax is ~1e-3 relative.
    return e * pl.reciprocal(jnp.sum(e, axis=-1, keepdims=True), approx=True)


def _bf16(x):
    return x.astype(jnp.bfloat16)


# ----------------------------- the fused ViT kernel -----------------------------
def _vit_kernel(patches_ref, tok_ref, w_patch_ref, w_head_ref, head_sp_ref,
                sp_ref, wqkv_ref, wmsa_ref, wfc1_ref, wfc2_ref, wadn_ref, wadu_ref,
                o_ref):
    f32 = jnp.float32

    # ---- patch embedding (row 0 is the zero cls slot; Create_Patch.fc1 has no bias) ----
    pe = jnp.dot(patches_ref[0], w_patch_ref[...], preferred_element_type=f32)   # (SEQ, E)
    x0 = pe + tok_ref[...]                                                        # f32

    def layer(l, x):
        sp = sp_ref[l]                                          # (SP_ROWS, SP_COLS) f32
        ln1_g = sp[ROW_LN1_G:ROW_LN1_G + 1, :EMBED]
        ln1_b = sp[ROW_LN1_B:ROW_LN1_B + 1, :EMBED]
        b_qkv = sp[ROW_BQKV:ROW_BQKV + 1, :3 * EMBED]           # Q part pre-scaled
        b_a1a = sp[ROW_BA1A:ROW_BA1A + 1, :R]
        b_a2a = sp[ROW_BA2A:ROW_BA2A + 1, :EMBED]
        ln2_g = sp[ROW_LN2_G:ROW_LN2_G + 1, :EMBED]
        ln2_b = sp[ROW_LN2_B:ROW_LN2_B + 1, :EMBED]
        b_fc1 = sp[ROW_BFC1:ROW_BFC1 + 1, :4 * EMBED]
        b_fc2 = sp[ROW_BFC2:ROW_BFC2 + 1, :EMBED]
        b_a1m = sp[ROW_BA1M:ROW_BA1M + 1, :R]
        b_a2m = sp[ROW_BA2M:ROW_BA2M + 1, :EMBED]

        wadn = wadn_ref[l]                                      # (E, 2R) bf16 [attn | mlp]
        wadu = wadu_ref[l]                                      # (2R, E) bf16 [attn ; mlp]

        # ----------------- Attention branch -----------------
        xn  = _layernorm(x, ln1_g, ln1_b)
        qkv = jnp.dot(_bf16(xn), wqkv_ref[l], preferred_element_type=f32) + b_qkv  # (SEQ, 3E)

        ctx_heads = []
        for h in range(NUM_HEAD):                               # H=4, unrolled
            qh = _bf16(qkv[:, h * DIM_HEAD:(h + 1) * DIM_HEAD])
            kh = _bf16(qkv[:, EMBED + h * DIM_HEAD:EMBED + (h + 1) * DIM_HEAD])
            vh = _bf16(qkv[:, 2 * EMBED + h * DIM_HEAD:2 * EMBED + (h + 1) * DIM_HEAD])
            s = jnp.einsum('qd,kd->qk', qh, kh, preferred_element_type=f32)        # (S, S)
            p = _softmax_lastdim(s)
            ctx_heads.append(jnp.dot(_bf16(p), vh, preferred_element_type=f32))    # (S, Dh)
        ctx = jnp.concatenate(ctx_heads, axis=-1)               # concat_heads layout (S, E)

        msa = jnp.dot(_bf16(ctx), wmsa_ref[l], preferred_element_type=f32)         # (S, E)
        ad  = jnp.dot(_bf16(msa), wadn[:, :R], preferred_element_type=f32) + b_a1a
        ad  = jnp.maximum(ad, 0.0)
        ad  = jnp.dot(_bf16(ad), wadu[:R, :], preferred_element_type=f32) + b_a2a
        x1  = (ad + msa) + x                                    # Residual(adapter, msa) + enc res

        # ------------------- MLP branch -------------------
        xn2 = _layernorm(x1, ln2_g, ln2_b)
        h1  = jnp.dot(_bf16(xn2), wfc1_ref[l], preferred_element_type=f32) + b_fc1
        h1  = _gelu_exact(h1)
        y   = jnp.dot(_bf16(h1), wfc2_ref[l], preferred_element_type=f32) + b_fc2
        am  = jnp.dot(_bf16(y), wadn[:, R:], preferred_element_type=f32) + b_a1m
        am  = jnp.maximum(am, 0.0)
        am  = jnp.dot(_bf16(am), wadu[R:, :], preferred_element_type=f32) + b_a2m
        return (am + y) + x1                                    # Residual(adapter, y) + enc res

    x_out = jax.lax.fori_loop(0, NUM_BLOCKS, layer, x0)

    # ---- final LayerNorm + MLPHead on the cls row ----
    hs  = head_sp_ref[...]                                      # (8, EMBED) f32
    cls = x_out[0:1, :]                                         # (1, E)
    z   = _layernorm(cls, hs[0:1, :], hs[1:2, :])
    logits = (jnp.dot(_bf16(z), w_head_ref[...], preferred_element_type=f32)
              + hs[2:3, :NUM_CLASSES])
    o_ref[0] = logits
    # TODO(synk): the PyTorch MLPHead prints cls.shape (debug side effect); intentionally omitted.


# ----------------------------- parameters -----------------------------
def init_params(key):
    keys = iter(jax.random.split(key, 8 + NUM_BLOCKS * 16))

    def nrm(shape, scale=0.02):
        return scale * jax.random.normal(next(keys), shape, dtype=jnp.float32)

    params = {
        'cls_token': nrm((1, EMBED)),
        'pos_emb':   nrm((SEQ, EMBED)),
        'w_patch':   nrm((PATCH_DIM, EMBED)),        # Create_Patch.fc1 (bias=False), (in, out)
        'ln_g':      jnp.ones((1, EMBED), jnp.float32),
        'ln_b':      jnp.zeros((1, EMBED), jnp.float32),
        'w_head':    nrm((EMBED, NUM_CLASSES)),
        'b_head':    nrm((1, NUM_CLASSES)),
        'blocks':    [],
    }
    for _ in range(NUM_BLOCKS):
        blk = {
            'ln1_g': jnp.ones((1, EMBED), jnp.float32),
            'ln1_b': jnp.zeros((1, EMBED), jnp.float32),
            'w_qkv': nrm((EMBED, 3 * EMBED)),        # cols [0,E)=Q (head-major), [E,2E)=K, [2E,3E)=V
            'b_qkv': nrm((1, 3 * EMBED)),
            'w_msa': nrm((EMBED, EMBED)),            # no bias
            'w_a1a': nrm((EMBED, R)),
            'b_a1a': nrm((1, R)),
            'w_a2a': nrm((R, EMBED)),
            'b_a2a': nrm((1, EMBED)),
            'ln2_g': jnp.ones((1, EMBED), jnp.float32),
            'ln2_b': jnp.zeros((1, EMBED), jnp.float32),
            'w_fc1': nrm((EMBED, 4 * EMBED)),
            'b_fc1': nrm((1, 4 * EMBED)),
            'w_fc2': nrm((4 * EMBED, EMBED)),
            'b_fc2': nrm((1, EMBED)),
            'w_a1m': nrm((EMBED, R)),
            'b_a1m': nrm((1, R)),
            'w_a2m': nrm((R, EMBED)),
            'b_a2m': nrm((1, EMBED)),
        }
        params['blocks'].append(blk)
    return params


def prepare_fused(params):
    """Scale / cast / pack / stack weights for the fused whole-model kernel.

    * The QKV reshape in PyTorch is (S, 3, H, Dh): Q = output columns [0, E), head-major.
      1/sqrt(Dh) is folded into the Q columns and the Q bias, so scores need no extra scale.
    * All LN gains/biases and linear biases are packed into one f32 (NUM_BLOCKS, 16, 256)
      blob; the adapter down/up weights into (NUM_BLOCKS, E, 2R) / (NUM_BLOCKS, 2R, E).
    * matmul weights are bf16 (f32 accumulation in kernel); biases / LN params stay f32.
    * Total resident weight footprint ~1.5 MB << scoped VMEM on v5e/v6e/v7x (incl. 64 MiB v7x),
      so no per-layer streaming and no vmem_limit_bytes tuning is needed.
    """
    inv_sc = 1.0 / math.sqrt(DIM_HEAD)
    bf16, f32 = jnp.bfloat16, jnp.float32

    wqkv_l, wmsa_l, wfc1_l, wfc2_l, wadn_l, wadu_l, sp_l = [], [], [], [], [], [], []
    for blk in params['blocks']:
        w_qkv = blk['w_qkv'].at[:, :EMBED].multiply(inv_sc)
        b_qkv = blk['b_qkv'][0].at[:EMBED].multiply(inv_sc)

        wqkv_l.append(w_qkv.astype(bf16))
        wmsa_l.append(blk['w_msa'].astype(bf16))
        wfc1_l.append(blk['w_fc1'].astype(bf16))
        wfc2_l.append(blk['w_fc2'].astype(bf16))
        wadn_l.append(jnp.concatenate([blk['w_a1a'], blk['w_a1m']], axis=1).astype(bf16))
        wadu_l.append(jnp.concatenate([blk['w_a2a'], blk['w_a2m']], axis=0).astype(bf16))

        sp = jnp.zeros((SP_ROWS, SP_COLS), f32)
        sp = sp.at[ROW_LN1_G, :EMBED].set(blk['ln1_g'][0])
        sp = sp.at[ROW_LN1_B, :EMBED].set(blk['ln1_b'][0])
        sp = sp.at[ROW_BQKV, :3 * EMBED].set(b_qkv)
        sp = sp.at[ROW_BA1A, :R].set(blk['b_a1a'][0])
        sp = sp.at[ROW_BA2A, :EMBED].set(blk['b_a2a'][0])
        sp = sp.at[ROW_LN2_G, :EMBED].set(blk['ln2_g'][0])
        sp = sp.at[ROW_LN2_B, :EMBED].set(blk['ln2_b'][0])
        sp = sp.at[ROW_BFC1, :4 * EMBED].set(blk['b_fc1'][0])
        sp = sp.at[ROW_BFC2, :EMBED].set(blk['b_fc2'][0])
        sp = sp.at[ROW_BA1M, :R].set(blk['b_a1m'][0])
        sp = sp.at[ROW_BA2M, :EMBED].set(blk['b_a2m'][0])
        sp_l.append(sp)

    head_sp = jnp.zeros((8, EMBED), f32)
    head_sp = head_sp.at[0].set(params['ln_g'][0])
    head_sp = head_sp.at[1].set(params['ln_b'][0])
    head_sp = head_sp.at[2, :NUM_CLASSES].set(params['b_head'][0])

    return {
        'wqkv':   jnp.stack(wqkv_l),                  # (L, E, 3E)  bf16
        'wmsa':   jnp.stack(wmsa_l),                  # (L, E, E)   bf16
        'wfc1':   jnp.stack(wfc1_l),                  # (L, E, 4E)  bf16
        'wfc2':   jnp.stack(wfc2_l),                  # (L, 4E, E)  bf16
        'wadn':   jnp.stack(wadn_l),                  # (L, E, 2R)  bf16
        'wadu':   jnp.stack(wadu_l),                  # (L, 2R, E)  bf16
        'small':  jnp.stack(sp_l),                    # (L, 16, 256) f32
        'tok':    params['pos_emb'].at[0].add(params['cls_token'][0]),   # (SEQ, E) f32
        'w_patch': params['w_patch'].astype(bf16),
        'w_head':  params['w_head'].astype(bf16),
        'head_sp': head_sp,                           # rows: ln_g, ln_b, b_head(+pad)
    }


# ----------------------------- forward pass -----------------------------
def vit_forward(x, fused):
    B = x.shape[0]
    gn = IMG_SIZE // PATCH

    # Create_Patch: identical patch order (row-major over the 4x4 grid, col fastest, and
    # Flatten(1) over (1, C, P, P)) expressed as one reshape/transpose.
    p = x.reshape(B, CHANNEL, gn, PATCH, gn, PATCH)
    p = jnp.transpose(p, (0, 2, 4, 1, 3, 5))               # (B, gr, gc, C, P, P)
    patches = p.reshape(B, NUM_PATCH, PATCH_DIM)
    # Prepend a zero "patch" per batch element so row 0 is the cls slot (fc1 has no bias).
    patches = jnp.concatenate(
        [jnp.zeros((B, 1, PATCH_DIM), patches.dtype), patches], axis=1)
    patches = patches.astype(jnp.bfloat16)                 # (B, SEQ, PATCH_DIM)

    def fixed(shape):
        nd = len(shape)
        return pl.BlockSpec(tuple(shape), lambda b, _n=nd: (0,) * _n)

    in_specs = [
        pl.BlockSpec((1, SEQ, PATCH_DIM), lambda b: (b, 0, 0)),     # patches, per image
        fixed((SEQ, EMBED)),                                        # cls+pos token bias
        fixed((PATCH_DIM, EMBED)),                                  # patch-embed weight
        fixed((EMBED, NUM_CLASSES)),                                # head weight
        fixed((8, EMBED)),                                          # final LN + head bias
        fixed((NUM_BLOCKS, SP_ROWS, SP_COLS)),                      # packed small params
        fixed((NUM_BLOCKS, EMBED, 3 * EMBED)),                      # fused QKV weights
        fixed((NUM_BLOCKS, EMBED, EMBED)),                          # msa weights
        fixed((NUM_BLOCKS, EMBED, 4 * EMBED)),                      # fc1 weights
        fixed((NUM_BLOCKS, 4 * EMBED, EMBED)),                      # fc2 weights
        fixed((NUM_BLOCKS, EMBED, 2 * R)),                          # adapter down weights
        fixed((NUM_BLOCKS, 2 * R, EMBED)),                          # adapter up weights
    ]

    out = pl.pallas_call(
        _vit_kernel,
        out_shape=jax.ShapeDtypeStruct((B, 1, NUM_CLASSES), jnp.float32),
        grid=(B,),
        in_specs=in_specs,
        out_specs=pl.BlockSpec((1, 1, NUM_CLASSES), lambda b: (b, 0, 0)),
        compiler_params=pltpu.CompilerParams(
            # batch axis is embarrassingly parallel -> shards across the 2 TCs on v7x;
            # on v5e/v6e it is simply 2 sequential steps (weights are not re-fetched).
            dimension_semantics=("parallel",)),
    )(patches, fused['tok'], fused['w_patch'], fused['w_head'], fused['head_sp'],
      fused['small'], fused['wqkv'], fused['wmsa'], fused['wfc1'], fused['wfc2'],
      fused['wadn'], fused['wadu'])
    return out[:, 0, :]


# ----------------------------- main -----------------------------
if __name__ == "__main__":
    key = jax.random.PRNGKey(0)
    pkey, xkey = jax.random.split(key)
    params = init_params(pkey)
    fused = prepare_fused(params)
    x = jax.random.normal(xkey, (BATCH, 1, CHANNEL, IMG_SIZE, IMG_SIZE), dtype=jnp.float32)

    out = jax.jit(vit_forward)(x, fused)
    out = jax.block_until_ready(out)
    assert out.shape == (BATCH, NUM_CLASSES), out.shape
    assert bool(jnp.all(jnp.isfinite(out)))
    print("KERNEL_OK")
</pallas_src>

<mosaic_0001>
module attributes {stable_mosaic.version = 11 : i64} {
  func.func @_vit_kernel(%arg0: i32, %arg1: memref<1x17x192xbf16, #tpu.memory_space<vmem>>, %arg2: memref<17x64xf32, #tpu.memory_space<vmem>>, %arg3: memref<192x64xbf16, #tpu.memory_space<vmem>>, %arg4: memref<64x10xbf16, #tpu.memory_space<vmem>>, %arg5: memref<8x64xf32, #tpu.memory_space<vmem>>, %arg6: memref<12x16x256xf32, #tpu.memory_space<vmem>>, %arg7: memref<12x64x192xbf16, #tpu.memory_space<vmem>>, %arg8: memref<12x64x64xbf16, #tpu.memory_space<vmem>>, %arg9: memref<12x64x256xbf16, #tpu.memory_space<vmem>>, %arg10: memref<12x256x64xbf16, #tpu.memory_space<vmem>>, %arg11: memref<12x64x16xbf16, #tpu.memory_space<vmem>>, %arg12: memref<12x16x64xbf16, #tpu.memory_space<vmem>>, %arg13: memref<1x1x10xf32, #tpu.memory_space<vmem>>) attributes {dimension_semantics = [#tpu.dimension_semantics<parallel>], iteration_bounds = array<i64: 2>, scalar_prefetch = 0 : i64, scratch_operands = 0 : i64, tpu.core_type = #tpu.core_type<tc>, window_params = [{transform_indices = @transform_0, window_bounds = array<i64: 1, 17, 192>}, {pipeline_mode = #tpu.pipeline_mode<synchronous>, transform_indices = @transform_1, window_bounds = array<i64: 17, 64>}, {pipeline_mode = #tpu.pipeline_mode<synchronous>, transform_indices = @transform_2, window_bounds = array<i64: 192, 64>}, {pipeline_mode = #tpu.pipeline_mode<synchronous>, transform_indices = @transform_3, window_bounds = array<i64: 64, 10>}, {pipeline_mode = #tpu.pipeline_mode<synchronous>, transform_indices = @transform_4, window_bounds = array<i64: 8, 64>}, {pipeline_mode = #tpu.pipeline_mode<synchronous>, transform_indices = @transform_5, window_bounds = array<i64: 12, 16, 256>}, {pipeline_mode = #tpu.pipeline_mode<synchronous>, transform_indices = @transform_6, window_bounds = array<i64: 12, 64, 192>}, {pipeline_mode = #tpu.pipeline_mode<synchronous>, transform_indices = @transform_7, window_bounds = array<i64: 12, 64, 64>}, {pipeline_mode = #tpu.pipeline_mode<synchronous>, transform_indices = @transform_8, window_bounds = array<i64: 12, 64, 256>}, {pipeline_mode = #tpu.pipeline_mode<synchronous>, transform_indices = @transform_9, window_bounds = array<i64: 12, 256, 64>}, {pipeline_mode = #tpu.pipeline_mode<synchronous>, transform_indices = @transform_10, window_bounds = array<i64: 12, 64, 16>}, {pipeline_mode = #tpu.pipeline_mode<synchronous>, transform_indices = @transform_11, window_bounds = array<i64: 12, 16, 64>}, {transform_indices = @transform_12, window_bounds = array<i64: 1, 1, 10>}]} {
    %c0 = arith.constant 0 : index
    %c0_0 = arith.constant 0 : index
    %c0_1 = arith.constant 0 : index
    %0 = vector.load %arg1[%c0, %c0_0, %c0_1] : memref<1x17x192xbf16, #tpu.memory_space<vmem>>, vector<1x17x192xbf16>
    %1 = vector.shape_cast %0 : vector<1x17x192xbf16> to vector<17x192xbf16>
    %c0_2 = arith.constant 0 : index
    %c0_3 = arith.constant 0 : index
    %2 = vector.load %arg3[%c0_2, %c0_3] : memref<192x64xbf16, #tpu.memory_space<vmem>>, vector<192x64xbf16>
    %cst = arith.constant dense<0.000000e+00> : vector<17x64xf32>
    %3 = tpu.matmul %1, %2, %cst {dimension_numbers = #tpu.dot_dimension_numbers<[1], [0], [0], [1], [0, 0, 1, 1], [], []>} : vector<17x192xbf16>, vector<192x64xbf16>, vector<17x64xf32> -> vector<17x64xf32>
    %c0_4 = arith.constant 0 : index
    %c0_5 = arith.constant 0 : index
    %4 = vector.load %arg2[%c0_4, %c0_5] : memref<17x64xf32, #tpu.memory_space<vmem>>, vector<17x64xf32>
    %5 = arith.addf %3, %4 : vector<17x64xf32>
    %c0_i32 = arith.constant 0 : i32
    %c12_i32 = arith.constant 12 : i32
    %6 = arith.addi %c0_i32, %c12_i32 : i32
    %c1_i32 = arith.constant 1 : i32
    %7 = scf.for %arg14 = %c0_i32 to %6 step %c1_i32 iter_args(%arg15 = %5) -> (vector<17x64xf32>)  : i32 {
      %40 = arith.index_cast %arg14 : i32 to index
      %c0_20 = arith.constant 0 : index
      %c0_21 = arith.constant 0 : index
      %41 = vector.load %arg6[%40, %c0_20, %c0_21] : memref<12x16x256xf32, #tpu.memory_space<vmem>>, vector<1x16x256xf32>
      %42 = vector.shape_cast %41 : vector<1x16x256xf32> to vector<16x256xf32>
      %43 = vector.extract_strided_slice %42 {offsets = [0, 0], sizes = [1, 64], strides = [1, 1]} : vector<16x256xf32> to vector<1x64xf32>
      %44 = vector.extract_strided_slice %42 {offsets = [1, 0], sizes = [1, 64], strides = [1, 1]} : vector<16x256xf32> to vector<1x64xf32>
      %45 = vector.extract_strided_slice %42 {offsets = [2, 0], sizes = [1, 192], strides = [1, 1]} : vector<16x256xf32> to vector<1x192xf32>
      %46 = vector.extract_strided_slice %42 {offsets = [3, 0], sizes = [1, 8], strides = [1, 1]} : vector<16x256xf32> to vector<1x8xf32>
      %47 = vector.extract_strided_slice %42 {offsets = [4, 0], sizes = [1, 64], strides = [1, 1]} : vector<16x256xf32> to vector<1x64xf32>
      %48 = vector.extract_strided_slice %42 {offsets = [5, 0], sizes = [1, 64], strides = [1, 1]} : vector<16x256xf32> to vector<1x64xf32>
      %49 = vector.extract_strided_slice %42 {offsets = [6, 0], sizes = [1, 64], strides = [1, 1]} : vector<16x256xf32> to vector<1x64xf32>
      %50 = vector.extract_strided_slice %42 {offsets = [7, 0], sizes = [1, 256], strides = [1, 1]} : vector<16x256xf32> to vector<1x256xf32>
      %51 = vector.extract_strided_slice %42 {offsets = [8, 0], sizes = [1, 64], strides = [1, 1]} : vector<16x256xf32> to vector<1x64xf32>
      %52 = vector.extract_strided_slice %42 {offsets = [9, 0], sizes = [1, 8], strides = [1, 1]} : vector<16x256xf32> to vector<1x8xf32>
      %53 = vector.extract_strided_slice %42 {offsets = [10, 0], sizes = [1, 64], strides = [1, 1]} : vector<16x256xf32> to vector<1x64xf32>
      %54 = arith.index_cast %arg14 : i32 to index
      %c0_22 = arith.constant 0 : index
      %c0_23 = arith.constant 0 : index
      %55 = vector.load %arg11[%54, %c0_22, %c0_23] : memref<12x64x16xbf16, #tpu.memory_space<vmem>>, vector<1x64x16xbf16>
      %56 = vector.shape_cast %55 : vector<1x64x16xbf16> to vector<64x16xbf16>
      %57 = arith.index_cast %arg14 : i32 to index
      %c0_24 = arith.constant 0 : index
      %c0_25 = arith.constant 0 : index
      %58 = vector.load %arg12[%57, %c0_24, %c0_25] : memref<12x16x64xbf16, #tpu.memory_space<vmem>>, vector<1x16x64xbf16>
      %59 = vector.shape_cast %58 : vector<1x16x64xbf16> to vector<16x64xbf16>
      %cst_26 = arith.constant dense<0.000000e+00> : vector<17xf32>
      %60 = vector.multi_reduction <add>, %arg15, %cst_26 [1] : vector<17x64xf32> to vector<17xf32>
      %61 = vector.shape_cast %60 : vector<17xf32> to vector<17x1xf32>
      %cst_27 = arith.constant 6.400000e+01 : f32
      %62 = vector.broadcast %cst_27 : f32 to vector<17x1xf32>
      %63 = arith.divf %61, %62 : vector<17x1xf32>
      %64 = vector.broadcast %63 : vector<17x1xf32> to vector<17x64xf32>
      %65 = arith.subf %arg15, %64 : vector<17x64xf32>
      %66 = arith.mulf %65, %65 : vector<17x64xf32>
      %cst_28 = arith.constant dense<0.000000e+00> : vector<17xf32>
      %67 = vector.multi_reduction <add>, %66, %cst_28 [1] : vector<17x64xf32> to vector<17xf32>
      %68 = vector.shape_cast %67 : vector<17xf32> to vector<17x1xf32>
      %cst_29 = arith.constant 6.400000e+01 : f32
      %69 = vector.broadcast %cst_29 : f32 to vector<17x1xf32>
      %70 = arith.divf %68, %69 : vector<17x1xf32>
      %71 = vector.broadcast %63 : vector<17x1xf32> to vector<17x64xf32>
      %72 = arith.subf %arg15, %71 : vector<17x64xf32>
      %cst_30 = arith.constant 9.99999997E-7 : f32
      %73 = vector.broadcast %cst_30 : f32 to vector<17x1xf32>
      %74 = arith.addf %70, %73 : vector<17x1xf32>
      %75 = math.rsqrt %74 : vector<17x1xf32>
      %76 = vector.broadcast %75 : vector<17x1xf32> to vector<17x64xf32>
      %77 = arith.mulf %72, %76 : vector<17x64xf32>
      %78 = vector.broadcast %43 : vector<1x64xf32> to vector<17x64xf32>
      %79 = arith.mulf %77, %78 : vector<17x64xf32>
      %80 = vector.broadcast %44 : vector<1x64xf32> to vector<17x64xf32>
      %81 = arith.addf %79, %80 : vector<17x64xf32>
      %82 = arith.truncf %81 : vector<17x64xf32> to vector<17x64xbf16>
      %83 = arith.index_cast %arg14 : i32 to index
      %c0_31 = arith.constant 0 : index
      %c0_32 = arith.constant 0 : index
      %84 = vector.load %arg7[%83, %c0_31, %c0_32] : memref<12x64x192xbf16, #tpu.memory_space<vmem>>, vector<1x64x192xbf16>
      %85 = vector.shape_cast %84 : vector<1x64x192xbf16> to vector<64x192xbf16>
      %cst_33 = arith.constant dense<0.000000e+00> : vector<17x192xf32>
      %86 = tpu.matmul %82, %85, %cst_33 {dimension_numbers = #tpu.dot_dimension_numbers<[1], [0], [0], [1], [0, 0, 1, 1], [], []>} : vector<17x64xbf16>, vector<64x192xbf16>, vector<17x192xf32> -> vector<17x192xf32>
      %87 = vector.broadcast %45 : vector<1x192xf32> to vector<17x192xf32>
      %88 = arith.addf %86, %87 : vector<17x192xf32>
      %89 = vector.extract_strided_slice %88 {offsets = [0, 0], sizes = [17, 16], strides = [1, 1]} : vector<17x192xf32> to vector<17x16xf32>
      %90 = arith.truncf %89 : vector<17x16xf32> to vector<17x16xbf16>
      %91 = vector.extract_strided_slice %88 {offsets = [0, 64], sizes = [17, 16], strides = [1, 1]} : vector<17x192xf32> to vector<17x16xf32>
      %92 = arith.truncf %91 : vector<17x16xf32> to vector<17x16xbf16>
      %93 = vector.extract_strided_slice %88 {offsets = [0, 128], sizes = [17, 16], strides = [1, 1]} : vector<17x192xf32> to vector<17x16xf32>
      %94 = arith.truncf %93 : vector<17x16xf32> to vector<17x16xbf16>
      "tpu.trace_start"() <{level = 10 : i32, message = "qd,kd->qk"}> : () -> ()
      %cst_34 = arith.constant dense<0.000000e+00> : vector<17x17xf32>
      %95 = tpu.matmul %90, %92, %cst_34 {dimension_numbers = #tpu.dot_dimension_numbers<[1], [1], [0], [0], [0, 0, 1, 0], [], []>} : vector<17x16xbf16>, vector<17x16xbf16>, vector<17x17xf32> -> vector<17x17xf32>
      "tpu.trace_stop"() : () -> ()
      %cst_35 = arith.constant dense<0xFF800000> : vector<17xf32>
      %96 = vector.multi_reduction <maximumf>, %95, %cst_35 [1] : vector<17x17xf32> to vector<17xf32>
      %97 = vector.shape_cast %96 : vector<17xf32> to vector<17x1xf32>
      %98 = vector.broadcast %97 : vector<17x1xf32> to vector<17x17xf32>
      %99 = arith.subf %95, %98 : vector<17x17xf32>
      %100 = math.exp %99 : vector<17x17xf32>
      %cst_36 = arith.constant dense<0.000000e+00> : vector<17xf32>
      %101 = vector.multi_reduction <add>, %100, %cst_36 [1] : vector<17x17xf32> to vector<17xf32>
      %102 = vector.shape_cast %101 : vector<17xf32> to vector<17x1xf32>
      %103 = tpu.reciprocal %102 {approx = true} : vector<17x1xf32> -> vector<17x1xf32>
      %104 = vector.broadcast %103 : vector<17x1xf32> to vector<17x17xf32>
      %105 = arith.mulf %100, %104 : vector<17x17xf32>
      %106 = arith.truncf %105 : vector<17x17xf32> to vector<17x17xbf16>
      %cst_37 = arith.constant dense<0.000000e+00> : vector<17x16xf32>
      %107 = tpu.matmul %106, %94, %cst_37 {dimension_numbers = #tpu.dot_dimension_numbers<[1], [0], [0], [1], [0, 0, 1, 1], [], []>} : vector<17x17xbf16>, vector<17x16xbf16>, vector<17x16xf32> -> vector<17x16xf32>
      %108 = vector.extract_strided_slice %88 {offsets = [0, 16], sizes = [17, 16], strides = [1, 1]} : vector<17x192xf32> to vector<17x16xf32>
      %109 = arith.truncf %108 : vector<17x16xf32> to vector<17x16xbf16>
      %110 = vector.extract_strided_slice %88 {offsets = [0, 80], sizes = [17, 16], strides = [1, 1]} : vector<17x192xf32> to vector<17x16xf32>
      %111 = arith.truncf %110 : vector<17x16xf32> to vector<17x16xbf16>
      %112 = vector.extract_strided_slice %88 {offsets = [0, 144], sizes = [17, 16], strides = [1, 1]} : vector<17x192xf32> to vector<17x16xf32>
      %113 = arith.truncf %112 : vector<17x16xf32> to vector<17x16xbf16>
      "tpu.trace_start"() <{level = 10 : i32, message = "qd,kd->qk"}> : () -> ()
      %cst_38 = arith.constant dense<0.000000e+00> : vector<17x17xf32>
      %114 = tpu.matmul %109, %111, %cst_38 {dimension_numbers = #tpu.dot_dimension_numbers<[1], [1], [0], [0], [0, 0, 1, 0], [], []>} : vector<17x16xbf16>, vector<17x16xbf16>, vector<17x17xf32> -> vector<17x17xf32>
      "tpu.trace_stop"() : () -> ()
      %cst_39 = arith.constant dense<0xFF800000> : vector<17xf32>
      %115 = vector.multi_reduction <maximumf>, %114, %cst_39 [1] : vector<17x17xf32> to vector<17xf32>
      %116 = vector.shape_cast %115 : vector<17xf32> to vector<17x1xf32>
      %117 = vector.broadcast %116 : vector<17x1xf32> to vector<17x17xf32>
      %118 = arith.subf %114, %117 : vector<17x17xf32>
      %119 = math.exp %118 : vector<17x17xf32>
      %cst_40 = arith.constant dense<0.000000e+00> : vector<17xf32>
      %120 = vector.multi_reduction <add>, %119, %cst_40 [1] : vector<17x17xf32> to vector<17xf32>
      %121 = vector.shape_cast %120 : vector<17xf32> to vector<17x1xf32>
      %122 = tpu.reciprocal %121 {approx = true} : vector<17x1xf32> -> vector<17x1xf32>
      %123 = vector.broadcast %122 : vector<17x1xf32> to vector<17x17xf32>
      %124 = arith.mulf %119, %123 : vector<17x17xf32>
      %125 = arith.truncf %124 : vector<17x17xf32> to vector<17x17xbf16>
      %cst_41 = arith.constant dense<0.000000e+00> : vector<17x16xf32>
      %126 = tpu.matmul %125, %113, %cst_41 {dimension_numbers = #tpu.dot_dimension_numbers<[1], [0], [0], [1], [0, 0, 1, 1], [], []>} : vector<17x17xbf16>, vector<17x16xbf16>, vector<17x16xf32> -> vector<17x16xf32>
      %127 = vector.extract_strided_slice %88 {offsets = [0, 32], sizes = [17, 16], strides = [1, 1]} : vector<17x192xf32> to vector<17x16xf32>
      %128 = arith.truncf %127 : vector<17x16xf32> to vector<17x16xbf16>
      %129 = vector.extract_strided_slice %88 {offsets = [0, 96], sizes = [17, 16], strides = [1, 1]} : vector<17x192xf32> to vector<17x16xf32>
      %130 = arith.truncf %129 : vector<17x16xf32> to vector<17x16xbf16>
      %131 = vector.extract_strided_slice %88 {offsets = [0, 160], sizes = [17, 16], strides = [1, 1]} : vector<17x192xf32> to vector<17x16xf32>
      %132 = arith.truncf %131 : vector<17x16xf32> to vector<17x16xbf16>
      "tpu.trace_start"() <{level = 10 : i32, message = "qd,kd->qk"}> : () -> ()
      %cst_42 = arith.constant dense<0.000000e+00> : vector<17x17xf32>
      %133 = tpu.matmul %128, %130, %cst_42 {dimension_numbers = #tpu.dot_dimension_numbers<[1], [1], [0], [0], [0, 0, 1, 0], [], []>} : vector<17x16xbf16>, vector<17x16xbf16>, vector<17x17xf32> -> vector<17x17xf32>
      "tpu.trace_stop"() : () -> ()
      %cst_43 = arith.constant dense<0xFF800000> : vector<17xf32>
      %134 = vector.multi_reduction <maximumf>, %133, %cst_43 [1] : vector<17x17xf32> to vector<17xf32>
      %135 = vector.shape_cast %134 : vector<17xf32> to vector<17x1xf32>
      %136 = vector.broadcast %135 : vector<17x1xf32> to vector<17x17xf32>
      %137 = arith.subf %133, %136 : vector<17x17xf32>
      %138 = math.exp %137 : vector<17x17xf32>
      %cst_44 = arith.constant dense<0.000000e+00> : vector<17xf32>
      %139 = vector.multi_reduction <add>, %138, %cst_44 [1] : vector<17x17xf32> to vector<17xf32>
      %140 = vector.shape_cast %139 : vector<17xf32> to vector<17x1xf32>
      %141 = tpu.reciprocal %140 {approx = true} : vector<17x1xf32> -> vector<17x1xf32>
      %142 = vector.broadcast %141 : vector<17x1xf32> to vector<17x17xf32>
      %143 = arith.mulf %138, %142 : vector<17x17xf32>
      %144 = arith.truncf %143 : vector<17x17xf32> to vector<17x17xbf16>
      %cst_45 = arith.constant dense<0.000000e+00> : vector<17x16xf32>
      %145 = tpu.matmul %144, %132, %cst_45 {dimension_numbers = #tpu.dot_dimension_numbers<[1], [0], [0], [1], [0, 0, 1, 1], [], []>} : vector<17x17xbf16>, vector<17x16xbf16>, vector<17x16xf32> -> vector<17x16xf32>
      %146 = vector.extract_strided_slice %88 {offsets = [0, 48], sizes = [17, 16], strides = [1, 1]} : vector<17x192xf32> to vector<17x16xf32>
      %147 = arith.truncf %146 : vector<17x16xf32> to vector<17x16xbf16>
      %148 = vector.extract_strided_slice %88 {offsets = [0, 112], sizes = [17, 16], strides = [1, 1]} : vector<17x192xf32> to vector<17x16xf32>
      %149 = arith.truncf %148 : vector<17x16xf32> to vector<17x16xbf16>
      %150 = vector.extract_strided_slice %88 {offsets = [0, 176], sizes = [17, 16], strides = [1, 1]} : vector<17x192xf32> to vector<17x16xf32>
      %151 = arith.truncf %150 : vector<17x16xf32> to vector<17x16xbf16>
      "tpu.trace_start"() <{level = 10 : i32, message = "qd,kd->qk"}> : () -> ()
      %cst_46 = arith.constant dense<0.000000e+00> : vector<17x17xf32>
      %152 = tpu.matmul %147, %149, %cst_46 {dimension_numbers = #tpu.dot_dimension_numbers<[1], [1], [0], [0], [0, 0, 1, 0], [], []>} : vector<17x16xbf16>, vector<17x16xbf16>, vector<17x17xf32> -> vector<17x17xf32>
      "tpu.trace_stop"() : () -> ()
      %cst_47 = arith.constant dense<0xFF800000> : vector<17xf32>
      %153 = vector.multi_reduction <maximumf>, %152, %cst_47 [1] : vector<17x17xf32> to vector<17xf32>
      %154 = vector.shape_cast %153 : vector<17xf32> to vector<17x1xf32>
      %155 = vector.broadcast %154 : vector<17x1xf32> to vector<17x17xf32>
      %156 = arith.subf %152, %155 : vector<17x17xf32>
      %157 = math.exp %156 : vector<17x17xf32>
      %cst_48 = arith.constant dense<0.000000e+00> : vector<17xf32>
      %158 = vector.multi_reduction <add>, %157, %cst_48 [1] : vector<17x17xf32> to vector<17xf32>
      %159 = vector.shape_cast %158 : vector<17xf32> to vector<17x1xf32>
      %160 = tpu.reciprocal %159 {approx = true} : vector<17x1xf32> -> vector<17x1xf32>
      %161 = vector.broadcast %160 : vector<17x1xf32> to vector<17x17xf32>
      %162 = arith.mulf %157, %161 : vector<17x17xf32>
      %163 = arith.truncf %162 : vector<17x17xf32> to vector<17x17xbf16>
      %cst_49 = arith.constant dense<0.000000e+00> : vector<17x16xf32>
      %164 = tpu.matmul %163, %151, %cst_49 {dimension_numbers = #tpu.dot_dimension_numbers<[1], [0], [0], [1], [0, 0, 1, 1], [], []>} : vector<17x17xbf16>, vector<17x16xbf16>, vector<17x16xf32> -> vector<17x16xf32>
      %165 = tpu.concatenate %107, %126, %145, %164 in 1 : vector<17x16xf32>, vector<17x16xf32>, vector<17x16xf32>, vector<17x16xf32> -> vector<17x64xf32>
      %166 = arith.truncf %165 : vector<17x64xf32> to vector<17x64xbf16>
      %167 = arith.index_cast %arg14 : i32 to index
      %c0_50 = arith.constant 0 : index
      %c0_51 = arith.constant 0 : index
      %168 = vector.load %arg8[%167, %c0_50, %c0_51] : memref<12x64x64xbf16, #tpu.memory_space<vmem>>, vector<1x64x64xbf16>
      %169 = vector.shape_cast %168 : vector<1x64x64xbf16> to vector<64x64xbf16>
      %cst_52 = arith.constant dense<0.000000e+00> : vector<17x64xf32>
      %170 = tpu.matmul %166, %169, %cst_52 {dimension_numbers = #tpu.dot_dimension_numbers<[1], [0], [0], [1], [0, 0, 1, 1], [], []>} : vector<17x64xbf16>, vector<64x64xbf16>, vector<17x64xf32> -> vector<17x64xf32>
      %171 = arith.truncf %170 : vector<17x64xf32> to vector<17x64xbf16>
      %172 = vector.extract_strided_slice %56 {offsets = [0, 0], sizes = [64, 8], strides = [1, 1]} : vector<64x16xbf16> to vector<64x8xbf16>
      %cst_53 = arith.constant dense<0.000000e+00> : vector<17x8xf32>
      %173 = tpu.matmul %171, %172, %cst_53 {dimension_numbers = #tpu.dot_dimension_numbers<[1], [0], [0], [1], [0, 0, 1, 1], [], []>} : vector<17x64xbf16>, vector<64x8xbf16>, vector<17x8xf32> -> vector<17x8xf32>
      %174 = vector.broadcast %46 : vector<1x8xf32> to vector<17x8xf32>
      %175 = arith.addf %173, %174 : vector<17x8xf32>
      %cst_54 = arith.constant 0.000000e+00 : f32
      %176 = vector.broadcast %cst_54 : f32 to vector<17x8xf32>
      %177 = arith.maximumf %175, %176 : vector<17x8xf32>
      %178 = arith.truncf %177 : vector<17x8xf32> to vector<17x8xbf16>
      %179 = vector.extract_strided_slice %59 {offsets = [0, 0], sizes = [8, 64], strides = [1, 1]} : vector<16x64xbf16> to vector<8x64xbf16>
      %cst_55 = arith.constant dense<0.000000e+00> : vector<17x64xf32>
      %180 = tpu.matmul %178, %179, %cst_55 {dimension_numbers = #tpu.dot_dimension_numbers<[1], [0], [0], [1], [0, 0, 1, 1], [], []>} : vector<17x8xbf16>, vector<8x64xbf16>, vector<17x64xf32> -> vector<17x64xf32>
      %181 = vector.broadcast %47 : vector<1x64xf32> to vector<17x64xf32>
      %182 = arith.addf %180, %181 : vector<17x64xf32>
      %183 = arith.addf %182, %170 : vector<17x64xf32>
      %184 = arith.addf %183, %arg15 : vector<17x64xf32>
      %cst_56 = arith.constant dense<0.000000e+00> : vector<17xf32>
      %185 = vector.multi_reduction <add>, %184, %cst_56 [1] : vector<17x64xf32> to vector<17xf32>
      %186 = vector.shape_cast %185 : vector<17xf32> to vector<17x1xf32>
      %cst_57 = arith.constant 6.400000e+01 : f32
      %187 = vector.broadcast %cst_57 : f32 to vector<17x1xf32>
      %188 = arith.divf %186, %187 : vector<17x1xf32>
      %189 = vector.broadcast %188 : vector<17x1xf32> to vector<17x64xf32>
      %190 = arith.subf %184, %189 : vector<17x64xf32>
      %191 = arith.mulf %190, %190 : vector<17x64xf32>
      %cst_58 = arith.constant dense<0.000000e+00> : vector<17xf32>
      %192 = vector.multi_reduction <add>, %191, %cst_58 [1] : vector<17x64xf32> to vector<17xf32>
      %193 = vector.shape_cast %192 : vector<17xf32> to vector<17x1xf32>
      %cst_59 = arith.constant 6.400000e+01 : f32
      %194 = vector.broadcast %cst_59 : f32 to vector<17x1xf32>
      %195 = arith.divf %193, %194 : vector<17x1xf32>
      %196 = vector.broadcast %188 : vector<17x1xf32> to vector<17x64xf32>
      %197 = arith.subf %184, %196 : vector<17x64xf32>
      %cst_60 = arith.constant 9.99999997E-7 : f32
      %198 = vector.broadcast %cst_60 : f32 to vector<17x1xf32>
      %199 = arith.addf %195, %198 : vector<17x1xf32>
      %200 = math.rsqrt %199 : vector<17x1xf32>
      %201 = vector.broadcast %200 : vector<17x1xf32> to vector<17x64xf32>
      %202 = arith.mulf %197, %201 : vector<17x64xf32>
      %203 = vector.broadcast %48 : vector<1x64xf32> to vector<17x64xf32>
      %204 = arith.mulf %202, %203 : vector<17x64xf32>
      %205 = vector.broadcast %49 : vector<1x64xf32> to vector<17x64xf32>
      %206 = arith.addf %204, %205 : vector<17x64xf32>
      %207 = arith.truncf %206 : vector<17x64xf32> to vector<17x64xbf16>
      %208 = arith.index_cast %arg14 : i32 to index
      %c0_61 = arith.constant 0 : index
      %c0_62 = arith.constant 0 : index
      %209 = vector.load %arg9[%208, %c0_61, %c0_62] : memref<12x64x256xbf16, #tpu.memory_space<vmem>>, vector<1x64x256xbf16>
      %210 = vector.shape_cast %209 : vector<1x64x256xbf16> to vector<64x256xbf16>
      %cst_63 = arith.constant dense<0.000000e+00> : vector<17x256xf32>
      %211 = tpu.matmul %207, %210, %cst_63 {dimension_numbers = #tpu.dot_dimension_numbers<[1], [0], [0], [1], [0, 0, 1, 1], [], []>} : vector<17x64xbf16>, vector<64x256xbf16>, vector<17x256xf32> -> vector<17x256xf32>
      %212 = vector.broadcast %50 : vector<1x256xf32> to vector<17x256xf32>
      %213 = arith.addf %211, %212 : vector<17x256xf32>
      %cst_64 = arith.constant 5.000000e-01 : f32
      %214 = vector.broadcast %cst_64 : f32 to vector<17x256xf32>
      %215 = arith.mulf %214, %213 : vector<17x256xf32>
      %cst_65 = arith.constant 0.707106769 : f32
      %216 = vector.broadcast %cst_65 : f32 to vector<17x256xf32>
      %217 = arith.mulf %213, %216 : vector<17x256xf32>
      %218 = math.erf %217 : vector<17x256xf32>
      %cst_66 = arith.constant 1.000000e+00 : f32
      %219 = vector.broadcast %cst_66 : f32 to vector<17x256xf32>
      %220 = arith.addf %219, %218 : vector<17x256xf32>
      %221 = arith.mulf %215, %220 : vector<17x256xf32>
      %222 = arith.truncf %221 : vector<17x256xf32> to vector<17x256xbf16>
      %223 = arith.index_cast %arg14 : i32 to index
      %c0_67 = arith.constant 0 : index
      %c0_68 = arith.constant 0 : index
      %224 = vector.load %arg10[%223, %c0_67, %c0_68] : memref<12x256x64xbf16, #tpu.memory_space<vmem>>, vector<1x256x64xbf16>
      %225 = vector.shape_cast %224 : vector<1x256x64xbf16> to vector<256x64xbf16>
      %cst_69 = arith.constant dense<0.000000e+00> : vector<17x64xf32>
      %226 = tpu.matmul %222, %225, %cst_69 {dimension_numbers = #tpu.dot_dimension_numbers<[1], [0], [0], [1], [0, 0, 1, 1], [], []>} : vector<17x256xbf16>, vector<256x64xbf16>, vector<17x64xf32> -> vector<17x64xf32>
      %227 = vector.broadcast %51 : vector<1x64xf32> to vector<17x64xf32>
      %228 = arith.addf %226, %227 : vector<17x64xf32>
      %229 = arith.truncf %228 : vector<17x64xf32> to vector<17x64xbf16>
      %230 = vector.extract_strided_slice %56 {offsets = [0, 8], sizes = [64, 8], strides = [1, 1]} : vector<64x16xbf16> to vector<64x8xbf16>
      %cst_70 = arith.constant dense<0.000000e+00> : vector<17x8xf32>
      %231 = tpu.matmul %229, %230, %cst_70 {dimension_numbers = #tpu.dot_dimension_numbers<[1], [0], [0], [1], [0, 0, 1, 1], [], []>} : vector<17x64xbf16>, vector<64x8xbf16>, vector<17x8xf32> -> vector<17x8xf32>
      %232 = vector.broadcast %52 : vector<1x8xf32> to vector<17x8xf32>
      %233 = arith.addf %231, %232 : vector<17x8xf32>
      %cst_71 = arith.constant 0.000000e+00 : f32
      %234 = vector.broadcast %cst_71 : f32 to vector<17x8xf32>
      %235 = arith.maximumf %233, %234 : vector<17x8xf32>
      %236 = arith.truncf %235 : vector<17x8xf32> to vector<17x8xbf16>
      %237 = vector.extract_strided_slice %59 {offsets = [8, 0], sizes = [8, 64], strides = [1, 1]} : vector<16x64xbf16> to vector<8x64xbf16>
      %cst_72 = arith.constant dense<0.000000e+00> : vector<17x64xf32>
      %238 = tpu.matmul %236, %237, %cst_72 {dimension_numbers = #tpu.dot_dimension_numbers<[1], [0], [0], [1], [0, 0, 1, 1], [], []>} : vector<17x8xbf16>, vector<8x64xbf16>, vector<17x64xf32> -> vector<17x64xf32>
      %239 = vector.broadcast %53 : vector<1x64xf32> to vector<17x64xf32>
      %240 = arith.addf %238, %239 : vector<17x64xf32>
      %241 = arith.addf %240, %228 : vector<17x64xf32>
      %242 = arith.addf %241, %184 : vector<17x64xf32>
      scf.yield %242 : vector<17x64xf32>
    }
    %c12_i32_6 = arith.constant 12 : i32
    %c0_7 = arith.constant 0 : index
    %c0_8 = arith.constant 0 : index
    %8 = vector.load %arg5[%c0_7, %c0_8] : memref<8x64xf32, #tpu.memory_space<vmem>>, vector<8x64xf32>
    %9 = vector.extract_strided_slice %7 {offsets = [0, 0], sizes = [1, 64], strides = [1, 1]} : vector<17x64xf32> to vector<1x64xf32>
    %10 = vector.extract_strided_slice %8 {offsets = [0, 0], sizes = [1, 64], strides = [1, 1]} : vector<8x64xf32> to vector<1x64xf32>
    %11 = vector.extract_strided_slice %8 {offsets = [1, 0], sizes = [1, 64], strides = [1, 1]} : vector<8x64xf32> to vector<1x64xf32>
    %cst_9 = arith.constant dense<0.000000e+00> : vector<1xf32>
    %12 = vector.multi_reduction <add>, %9, %cst_9 [1] : vector<1x64xf32> to vector<1xf32>
    %13 = vector.shape_cast %12 : vector<1xf32> to vector<1x1xf32>
    %cst_10 = arith.constant 6.400000e+01 : f32
    %14 = vector.broadcast %cst_10 : f32 to vector<1x1xf32>
    %15 = arith.divf %13, %14 : vector<1x1xf32>
    %16 = vector.broadcast %15 : vector<1x1xf32> to vector<1x64xf32>
    %17 = arith.subf %9, %16 : vector<1x64xf32>
    %18 = arith.mulf %17, %17 : vector<1x64xf32>
    %cst_11 = arith.constant dense<0.000000e+00> : vector<1xf32>
    %19 = vector.multi_reduction <add>, %18, %cst_11 [1] : vector<1x64xf32> to vector<1xf32>
    %20 = vector.shape_cast %19 : vector<1xf32> to vector<1x1xf32>
    %cst_12 = arith.constant 6.400000e+01 : f32
    %21 = vector.broadcast %cst_12 : f32 to vector<1x1xf32>
    %22 = arith.divf %20, %21 : vector<1x1xf32>
    %23 = vector.broadcast %15 : vector<1x1xf32> to vector<1x64xf32>
    %24 = arith.subf %9, %23 : vector<1x64xf32>
    %cst_13 = arith.constant 9.99999997E-7 : f32
    %25 = vector.broadcast %cst_13 : f32 to vector<1x1xf32>
    %26 = arith.addf %22, %25 : vector<1x1xf32>
    %27 = math.rsqrt %26 : vector<1x1xf32>
    %28 = vector.broadcast %27 : vector<1x1xf32> to vector<1x64xf32>
    %29 = arith.mulf %24, %28 : vector<1x64xf32>
    %30 = arith.mulf %29, %10 : vector<1x64xf32>
    %31 = arith.addf %30, %11 : vector<1x64xf32>
    %32 = arith.truncf %31 : vector<1x64xf32> to vector<1x64xbf16>
    %c0_14 = arith.constant 0 : index
    %c0_15 = arith.constant 0 : index
    %33 = vector.load %arg4[%c0_14, %c0_15] : memref<64x10xbf16, #tpu.memory_space<vmem>>, vector<64x10xbf16>
    %cst_16 = arith.constant dense<0.000000e+00> : vector<1x10xf32>
    %34 = tpu.matmul %32, %33, %cst_16 {dimension_numbers = #tpu.dot_dimension_numbers<[1], [0], [0], [1], [0, 0, 1, 1], [], []>} : vector<1x64xbf16>, vector<64x10xbf16>, vector<1x10xf32> -> vector<1x10xf32>
    %35 = vector.extract_strided_slice %8 {offsets = [2, 0], sizes = [1, 10], strides = [1, 1]} : vector<8x64xf32> to vector<1x10xf32>
    %36 = arith.addf %34, %35 : vector<1x10xf32>
    %c0_17 = arith.constant 0 : index
    %c0_18 = arith.constant 0 : index
    %c0_19 = arith.constant 0 : index
    %37 = vector.load %arg13[%c0_17, %c0_18, %c0_19] : memref<1x1x10xf32, #tpu.memory_space<vmem>>, vector<1x1x10xf32>
    %38 = vector.shape_cast %37 : vector<1x1x10xf32> to vector<1x10xf32>
    %39 = vector.shape_cast %36 : vector<1x10xf32> to vector<1x1x10xf32>
    tpu.vector_store %arg13[%c0_17, %c0_18, %c0_19], %39 {strides = array<i32>} : memref<1x1x10xf32, #tpu.memory_space<vmem>>, vector<1x1x10xf32>,
    return
  }
  func.func @transform_0(%arg0: i32) -> (i32, i32, i32) {
    %c0_i32 = arith.constant 0 : i32
    %c0_i32_0 = arith.constant 0 : i32
    %c0_i32_1 = arith.constant 0 : i32
    return %arg0, %c0_i32, %c0_i32_0 : i32, i32, i32
  }
  func.func @transform_1(%arg0: i32) -> (i32, i32) {
    %c0_i32 = arith.constant 0 : i32
    %c0_i32_0 = arith.constant 0 : i32
    %c0_i32_1 = arith.constant 0 : i32
    return %c0_i32, %c0_i32_0 : i32, i32
  }
  func.func @transform_2(%arg0: i32) -> (i32, i32) {
    %c0_i32 = arith.constant 0 : i32
    %c0_i32_0 = arith.constant 0 : i32
    %c0_i32_1 = arith.constant 0 : i32
    return %c0_i32, %c0_i32_0 : i32, i32
  }
  func.func @transform_3(%arg0: i32) -> (i32, i32) {
    %c0_i32 = arith.constant 0 : i32
    %c0_i32_0 = arith.constant 0 : i32
    %c0_i32_1 = arith.constant 0 : i32
    return %c0_i32, %c0_i32_0 : i32, i32
  }
  func.func @transform_4(%arg0: i32) -> (i32, i32) {
    %c0_i32 = arith.constant 0 : i32
    %c0_i32_0 = arith.constant 0 : i32
    %c0_i32_1 = arith.constant 0 : i32
    return %c0_i32, %c0_i32_0 : i32, i32
  }
  func.func @transform_5(%arg0: i32) -> (i32, i32, i32) {
    %c0_i32 = arith.constant 0 : i32
    %c0_i32_0 = arith.constant 0 : i32
    %c0_i32_1 = arith.constant 0 : i32
    %c0_i32_2 = arith.constant 0 : i32
    return %c0_i32, %c0_i32_0, %c0_i32_1 : i32, i32, i32
  }
  func.func @transform_6(%arg0: i32) -> (i32, i32, i32) {
    %c0_i32 = arith.constant 0 : i32
    %c0_i32_0 = arith.constant 0 : i32
    %c0_i32_1 = arith.constant 0 : i32
    %c0_i32_2 = arith.constant 0 : i32
    return %c0_i32, %c0_i32_0, %c0_i32_1 : i32, i32, i32
  }
  func.func @transform_7(%arg0: i32) -> (i32, i32, i32) {
    %c0_i32 = arith.constant 0 : i32
    %c0_i32_0 = arith.constant 0 : i32
    %c0_i32_1 = arith.constant 0 : i32
    %c0_i32_2 = arith.constant 0 : i32
    return %c0_i32, %c0_i32_0, %c0_i32_1 : i32, i32, i32
  }
  func.func @transform_8(%arg0: i32) -> (i32, i32, i32) {
    %c0_i32 = arith.constant 0 : i32
    %c0_i32_0 = arith.constant 0 : i32
    %c0_i32_1 = arith.constant 0 : i32
    %c0_i32_2 = arith.constant 0 : i32
    return %c0_i32, %c0_i32_0, %c0_i32_1 : i32, i32, i32
  }
  func.func @transform_9(%arg0: i32) -> (i32, i32, i32) {
    %c0_i32 = arith.constant 0 : i32
    %c0_i32_0 = arith.constant 0 : i32
    %c0_i32_1 = arith.constant 0 : i32
    %c0_i32_2 = arith.constant 0 : i32
    return %c0_i32, %c0_i32_0, %c0_i32_1 : i32, i32, i32
  }
  func.func @transform_10(%arg0: i32) -> (i32, i32, i32) {
    %c0_i32 = arith.constant 0 : i32
    %c0_i32_0 = arith.constant 0 : i32
    %c0_i32_1 = arith.constant 0 : i32
    %c0_i32_2 = arith.constant 0 : i32
    return %c0_i32, %c0_i32_0, %c0_i32_1 : i32, i32, i32
  }
  func.func @transform_11(%arg0: i32) -> (i32, i32, i32) {
    %c0_i32 = arith.constant 0 : i32
    %c0_i32_0 = arith.constant 0 : i32
    %c0_i32_1 = arith.constant 0 : i32
    %c0_i32_2 = arith.constant 0 : i32
    return %c0_i32, %c0_i32_0, %c0_i32_1 : i32, i32, i32
  }
  func.func @transform_12(%arg0: i32) -> (i32, i32, i32) {
    %c0_i32 = arith.constant 0 : i32
    %c0_i32_0 = arith.constant 0 : i32
    %c0_i32_1 = arith.constant 0 : i32
    return %arg0, %c0_i32, %c0_i32_0 : i32, i32, i32
  }
}

</mosaic_0001>

<bundles_post_ra>
// kernel: vit_forward.1
= control target key start
LH: loop header
LB: loop body
LE: loop exit
PB: predicated region body
PF: predicated region fallthrough
CT: control target
= control target key end

     0   :  { %17 = vsyncpa [#allocation3], 0  ;;  %s3693_s0 = inlined_call_operand.vmem [shape: bf16[2,17,192], index: 0, kind: input, shape index: {}]   ;;  %s3694_s1 = inlined_call_operand.vmem [shape: f32[17,64], index: 1, kind: input, shape index: {}]   ;;  %s3695_s2 = inlined_call_operand.vmem [shape: bf16[192,64], index: 2, kind: input, shape index: {}]   ;;  %s3696_s3 = inlined_call_operand.vmem [shape: bf16[64,10], index: 3, kind: input, shape index: {}]   ;;  %s3697_s4 = inlined_call_operand.vmem [shape: f32[8,64], index: 4, kind: input, shape index: {}]   ;;  %s3698_s5 = inlined_call_operand.vmem [shape: f32[12,16,256], index: 5, kind: input, shape index: {}]   ;;  %s3699_s6 = inlined_call_operand.vmem [shape: bf16[12,64,192], index: 6, kind: input, shape index: {}]   ;;  %s3700_s7 = inlined_call_operand.vmem [shape: bf16[12,64,64], index: 7, kind: input, shape index: {}]   ;;  %s3701_s8 = inlined_call_operand.vmem [shape: bf16[12,64,256], index: 8, kind: input, shape index: {}]   ;;  %s3702_s9 = inlined_call_operand.vmem [shape: bf16[12,256,64], index: 9, kind: input, shape index: {}]   ;;  %s3703_s10 = inlined_call_operand.vmem [shape: bf16[12,64,16], index: 10, kind: input, shape index: {}]   ;;  %s3704_s11 = inlined_call_operand.vmem [shape: bf16[12,16,64], index: 11, kind: input, shape index: {}]   ;;  %s3705_s12 = inlined_call_operand.hbm [shape: f32[2,1,10], index: 12, kind: output, shape index: {}]  }
   0x1   :  { %19 = vsyncpa [#allocation3 + $0x1], 0  ;;  %s2992_s21 = smov 0   ;;  %s2994_s22 = smov 0  }
   0x2   :  { %s2996_s23 = smov 0   ;;  %s2998_s24 = smov 0  }
   0x3 LB: > { %3710 = sst [smem:[#allocation5_spill]] %s2895_s23  ;;  %s3013_s25 = sadd.s32 4294967295, %s2899_s24   ;;  %s2899_s24 = sphi %s2998_s24, %s3721_s24   ;;  %s2895_s23 = sphi %s2996_s23, %s3723_s23   ;;  %s2891_s22 = sphi %s2994_s22, %s3725_s22   ;;  %s2887_s21 = sphi %s2992_s21, %s3724_s21  }
   0x4   : > { %s2275_s26 = sadd.s32 4294967294, %s2899_s24   ;;  %s3017_s27 = sadd.s32 1, %s2899_s24  }
   0x5   : > { %3711 = sst [smem:[#allocation6_spill]] %s3017_s27  ;;  %s289_s28 = sadd.s32 1, %s2895_s23 }
   0x6   : > { %s286_s29 = ssub.s32 %s2899_s24, %s3017_s27  ;;  %p299_p0 = scmp.ne.s32.totalorder %s2895_s23, %s2891_s22 }
   0x7   : > { %p287_p1 = scmp.eq.s32.totalorder %s286_s29, 0  ;;  %p300_p2 = scmp.eq.s32.totalorder %s3013_s25, 1 }
   0x8   : > { %p305_p3 = scmp.ne.s32.totalorder %s2891_s22, %s2887_s21  ;;  %p306_p4 = scmp.eq.s32.totalorder %s2275_s26, 1 }
   0x9   : > { %s3028_s30 = scalar_select %p287_p1, %s2895_s23, %s289_s28  }
   0xa   : > { %p3030_p5 = por %p300_p2, %p299_p0  ;;  %p3034_p6 = por %p306_p4, %p305_p3 }
   0xb   : > { %3712 = sst [smem:[#allocation7_spill]] %s3028_s30  ;;  %p2278_p7 = scmp.ge.s32.totalorder %s2899_s24, 1 }
   0xc   : > { %p365_p8 = scmp.lt.s32.totalorder %s2899_s24, 3 }
   0xe   : > { %p366_p9 = pnand %p2278_p7, %p365_p8 }
   0xf   : > { %p406_p10 = scmp.lt.s32.totalorder (!%p366_p9), %s3013_s25, 1  ;;  %s3103_s27 = smov (!%p366_p9), 0  }
  0x10   : > { %369 = sbr.rel (%p366_p9) target bundleno = 3724 (0xe8c), region = 68 }
  0x15   : > { %v2578_v0 = vld [vmem:[%s3695_s2 + $0x38] sm:$0xff]  ;;  %v2577_v2 = vld [vmem:[%s3695_s2 + $0x30] sm:$0xff]  ;;  %s407_s28 = scalar_select %p406_p10, %s3013_s25, 1  ;;  %v2576_v4 = vld [vmem:[%s3695_s2 + $0x28] sm:$0xff]  ;;  %vm529_vm0 = vcmask 523264  }
  0x16   : > { %v2582_v1 = vld [vmem:[%s3695_s2 + $0x58] sm:$0xff]  ;;  %536 = vmatpush.bf16.msra.mxu0 %v2578_v0  ;;  %2634 = vmatpush.bf16.msra.mxu2 %v2578_v0  ;;  %v2581_v3 = vld [vmem:[%s3695_s2 + $0x50] sm:$0xff]  ;;  %v2580_v5 = vld [vmem:[%s3695_s2 + $0x48] sm:$0xff] }
  0x17   : > { %558 = vmatpush.bf16.msra.mxu1 %v2582_v1  ;;  %s2646_s15 = smul.u32 24, %s407_s28  ;;  %v2575_v6 = vld [vmem:[%s3695_s2 + $0x20] sm:$0xff]  ;;  %v2574_v11 = vld [vmem:[%s3695_s2 + $0x18] sm:$0xff]  ;;  %v2573_v12 = vld [vmem:[%s3695_s2 + $0x10] sm:$0xff] }
  0x18   : > { %v2579_v7 = vld [vmem:[%s3695_s2 + $0x40] sm:$0xff]  ;;  %v2572_v13 = vld [vmem:[%s3695_s2 + $0x8] sm:$0xff]  ;;  %v441_v30 = vld [vmem:[%s3694_s1 + $0x10] sm:$0x1] }
  0x19   : > { %s410_s23 = scalar_lea.vmem %s3693_s0, %s2646_s15  ;;  %v2571_v15 = vld [vmem:[%s3695_s2] sm:$0xff]  ;;  %v440_v31 = vld [vmem:[%s3694_s1 + $0x8] sm:$0xff]  ;;  %s3715_s15 = sand.u32 1, %s2891_s22  }
  0x1a   : > { %537 = vmatpush.bf16.msra.mxu0 %v2577_v2  ;;  %2635 = vmatpush.bf16.msra.mxu2 %v2577_v2  ;;  %v2569_v8 = vld [vmem:[%s410_s23 + $0x4] sm:$0xf]  ;;  %v2284_v9 = vld [vmem:[%s410_s23 + $0x8] sm:$0xf0]  ;;  %v414_v14 = vld [vmem:[%s410_s23 + $0x10] sm:$0x11] }
  0x1b   : > { %559 = vmatpush.bf16.msra.mxu1 %v2581_v3  ;;  %v2287_v10 = vor.u32 %v2569_v8, %v2284_v9  ;;  %v2282_v16 = vld [vmem:[%s410_s23] sm:$0xf]  ;;  %v2570_v17 = vld [vmem:[%s410_s23 + $0x4] sm:$0xf0]  ;;  %v449_v18 = vunpack.c.l.b16 %v414_v14  ;;  %v450_v19 = vunpack.c.h.b16 %v414_v14  ;;  %s3095_s18 = scalar_lea.vmem [#allocation2], %s3715_s15 }
  0x1c   : > { %v2283_v20 = vor.u32 %v2570_v17, %v2282_v16  ;;  %v439_v25 = vld [vmem:[%s3694_s1] sm:$0xff] }
  0x1d   : > { %v453_v21 = vpack.c.b16 %v449_v18, %v449_v18  ;;  %v454_v22 = vpack.c.b16 %v450_v19, %v450_v19 }
  0x1e   : > { %538 = vmatpush.bf16.msra.mxu0 %v2576_v4  ;;  %2636 = vmatpush.bf16.msra.mxu2 %v2576_v4 }
  0x1f   : > { %560 = vmatpush.bf16.msra.mxu1 %v2580_v5 }
  0x22   : > { %539 = vmatpush.bf16.msra.mxu0 %v2575_v6  ;;  %2637 = vmatpush.bf16.msra.mxu2 %v2575_v6 }
  0x23   : > { %561 = vmatpush.bf16.msra.mxu1 %v2579_v7 }
  0x26   : > { %2336 = vmatmul.msk.bf16.vlgmr.msra.gmra.mxu1 %vm529_vm0, %v2287_v10  ;;  %540 = vmatpush.bf16.msra.mxu0 %v2574_v11 }
  0x27   : > { %2638 = vmatpush.bf16.msra.mxu2 %v2574_v11 }
  0x2a   : > { %541 = vmatpush.bf16.msra.mxu0 %v2573_v12 }
  0x2b   : > { %2639 = vmatpush.bf16.msra.mxu2 %v2573_v12 }
  0x2e   : > { %542 = vmatpush.bf16.msra.mxu0 %v2572_v13 }
  0x2f   : > { %2640 = vmatpush.bf16.msra.mxu2 %v2572_v13 }
  0x32   : > { %543 = vmatpush.bf16.msra.mxu0 %v2571_v15 }
  0x33   : > { %2641 = vmatpush.bf16.msra.mxu2 %v2571_v15 }
  0x35   : > { %544 = vmatmul.bf16.vlgmr.msra.gmra.mxu0 %v2283_v20 }
  0x36   : > { %549 = vmatmul.bf16.vlgmr.msra.gmra.mxu2 %v453_v21  ;;  %2337 = vmatmul.msk.bf16.gmra.mxu1 %vm529_vm0, %v454_v22 }
  0xa3   : > { %v563_v23 = vpop.f32.mrf.mxu1 }
  0xab   : > { %v565_v24 = vpop.f32.mrf.mxu1 }
  0xb2   : > { %v545_v26 = vpop.f32.mrf.mxu0 }
  0xb3   : > { %v546_v27 = vadd.f32 %v545_v26, %v439_v25  ;;  %v568_v28 = vpop.f32.mrf.mxu1 }
  0xb5   : > { %v564_v29 = vadd.f32 %v563_v23, %v546_v27  }
  0xb9   : > { %v550_v32 = vpop.f32.mrf.mxu2 }
  0xba   : > { %v551_v33 = vadd.f32 %v550_v32, %v441_v30  ;;  %v547_v34 = vpop.f32.mrf.mxu0 }
  0xbb   : > { %v548_v35 = vadd.f32 %v547_v34, %v440_v31  ;;  %v570_v36 = vpop.f32.mrf.mxu1 }
  0xbc   : > { %v569_v37 = vadd.f32 %v568_v28, %v551_v33  }
  0xbd   : > { %v566_v38 = vadd.f32 %v565_v24, %v548_v35  }
  0xc1   : > { %v552_v39 = vpop.f32.mrf.mxu2 }
  0xc2 LB: >> { %vm609_vm1 = vcmask 516096   ;;  %v606_v41 = vsel %vm529_vm0, %v2907_v38, 0.0  ;;  %v603_v42 = vsel %vm529_vm0, %v2911_v29, 0.0  ;;  %v2917_v43 = vmov 64.0   ;;  %s3709_s19 = sshll.u32 %s2915_s27, 6  ;;  %s3173_s29 = sshll.u32 %s2915_s27, 5  ;;  %s2915_s27 = sphi %s3103_s27, %s577_s27   ;;  %v2911_v29 = vphi %v564_v29, %v3719_v29   ;;  %v2907_v38 = vphi %v566_v38, %v2088_v38   ;;  %v2903_v37 = vphi %v569_v37, %v2089_v37  }
  0xc3   : >> { %v610_v40 = vsel %vm609_vm1, %v2903_v37, 0.0  ;;  %607 = vadd.xlane.f32.xlu1 %v606_v41  ;;  %2743 = vrcp.f32 %v2917_v43  ;;  %s3152_s30 = scalar_lea.vmem %s3699_s6, %s3709_s19  ;;  %s3179_s16 = scalar_lea.vmem %s3698_s5, %s3173_s29  ;;  %vm866_vm12 = vcmask 1040384   ;;  %vm792_vm13 = vcmask 130048  }
  0xc4   : >> { %611 = vadd.xlane.f32.xlu0 %v610_v40  ;;  %v2372_v1 = vld [vmem:[%s3152_s30 + $0x30] sm:$0xf]  ;;  %v2598_v2 = vld [vmem:[%s3152_s30 + $0x34] sm:$0xf0]  ;;  %v2364_v4 = vld [vmem:[%s3152_s30 + $0x20] sm:$0xf]  ;;  %s589_s19 = scalar_lea.vmem %s3703_s10, %s3173_s29 }
  0xc5   : >> { %v2373_v3 = vor.u32 %v2598_v2, %v2372_v1  ;;  %v2596_v5 = vld [vmem:[%s3152_s30 + $0x24] sm:$0xf0]  ;;  %v2356_v7 = vld [vmem:[%s3152_s30 + $0x10] sm:$0xf]  ;;  %v2594_v8 = vld [vmem:[%s3152_s30 + $0x14] sm:$0xf0] }
  0xc6   : >> { %v2365_v6 = vor.u32 %v2596_v5, %v2364_v4  ;;  %v2357_v9 = vor.u32 %v2594_v8, %v2356_v7  ;;  %v2348_v10 = vld [vmem:[%s3152_s30] sm:$0xf]  ;;  %v2592_v11 = vld [vmem:[%s3152_s30 + $0x4] sm:$0xf0]  ;;  %v2597_v13 = vld [vmem:[%s3152_s30 + $0x34] sm:$0xf] }
  0xc7   : >> { %2642 = vmatpush.bf16.msra.mxu2 %v2373_v3  ;;  %750 = vmatpush.bf16.msra.mxu0 %v2373_v3  ;;  %v2349_v12 = vor.u32 %v2592_v11, %v2348_v10  ;;  %v2374_v14 = vld [vmem:[%s3152_s30 + $0x38] sm:$0xf0]  ;;  %v2595_v18 = vld [vmem:[%s3152_s30 + $0x24] sm:$0xf]  ;;  %v2366_v19 = vld [vmem:[%s3152_s30 + $0x28] sm:$0xf0] }
  0xc8   : >> { %v2377_v15 = vor.u32 %v2597_v13, %v2374_v14  ;;  %v2369_v20 = vor.u32 %v2595_v18, %v2366_v19  ;;  %v2593_v22 = vld [vmem:[%s3152_s30 + $0x14] sm:$0xf]  ;;  %v2358_v23 = vld [vmem:[%s3152_s30 + $0x18] sm:$0xf0]  ;;  %v2591_v25 = vld [vmem:[%s3152_s30 + $0x4] sm:$0xf] }
  0xc9   : >> { %v2744_v44 = vpop.eup %2743  ;;  %v2361_v24 = vor.u32 %v2593_v22, %v2358_v23  ;;  %v2350_v26 = vld [vmem:[%s3152_s30 + $0x8] sm:$0xf0]  ;;  %v3183_v41 = vld [vmem:[%s3179_s16] sm:$0xff]  ;;  %s2918_s17 = smov 64   ;;  %vm823_vm14 = vcmask 138240   ;;  %vm830_vm15 = vcmask 131072  }
  0xca   : >> { %v614_v45 = vmul.f32 64.0, %v2744_v44  ;;  %vm618_vm2 = vweird.f32 %v2744_v44  ;;  %768 = vmatpush.bf16.msra.mxu1 %v2377_v15  ;;  %v2353_v28 = vor.u32 %v2591_v25, %v2350_v26  ;;  %v2919_v25 = vmov 0   ;;  %s2920_s15 = smov 112   ;;  %s2921_s20 = smov 16  }
  0xcb   : >> { %2643 = vmatpush.bf16.msra.mxu2 %v2365_v6  ;;  %751 = vmatpush.bf16.msra.mxu0 %v2365_v6  ;;  %v3202_v26 = vsel %vm866_vm12, 65535, %v2919_v25  ;;  %s2922_s26 = smov 48   ;;  %s2923_s30 = smov 80  }
  0xcc   : >> { %604 = vadd.xlane.f32.xlu0 %v603_v42  ;;  %v615_v46 = vsub.f32 1.0, %v614_v45  ;;  %s2924_s23 = smov 32   ;;  %s2925_s28 = smov 96  }
  0xce   : >> { %v616_v47 = vmul.f32 %v2744_v44, %v615_v46  ;;  %769 = vmatpush.bf16.msra.mxu1 %v2369_v20  ;;  %v677_v46 = vperm.slane %v3183_v41, 0 }
  0xcf   : >> { %2644 = vmatpush.bf16.msra.mxu2 %v2357_v9  ;;  %752 = vmatpush.bf16.msra.mxu0 %v2357_v9 }
  0xd0   : >> { %v617_v48 = vadd.f32 %v2744_v44, %v616_v47 }
  0xd2   : >> { %v3123_v49 = vsel %vm618_vm2, %v2744_v44, %v617_v48  ;;  %770 = vmatpush.bf16.msra.mxu1 %v2361_v24  ;;  %vm1246_vm2 = vcmask 261120  }
  0xd3   : >> { %2645 = vmatpush.bf16.msra.mxu2 %v2349_v12  ;;  %753 = vmatpush.bf16.msra.mxu0 %v2349_v12 }
  0xd6   : >> { %771 = vmatpush.bf16.msra.mxu1 %v2353_v28 }
 0x136   : >> { %v608_v54 = vpop.xlane.xlu1 %607 }
 0x137   : >> { %v612_v50 = vpop.xlane.xlu0 %611  ;;  %v621_v58 = vmul.f32 %v3123_v49, %v608_v54 }
 0x138   : >> { %v622_v51 = vmul.f32 %v3123_v49, %v612_v50 }
 0x139   : >> { %v3138_v60 = vsub.f32 %v2907_v38, %v621_v58 }
 0x13a   : >> { %v3127_v52 = vsub.f32 %v2903_v37, %v622_v51  ;;  %v681_v51 = vperm.slane %v3183_v41, 1 }
 0x13b   : >> { %v627_v63 = vmul.f32 %v3138_v60, %v3138_v60 }
 0x13c   : >> { %v628_v53 = vmul.f32 %v3127_v52, %v3127_v52 }
 0x13d   : >> { %v632_v0 = vsel %vm529_vm0, %v627_v63, 0.0 }
 0x13e   : >> { %v635_v55 = vsel %vm609_vm1, %v628_v53, 0.0 }
 0x13f   : >> { %636 = vadd.xlane.f32.xlu1 %v635_v55  ;;  %v605_v56 = vpop.xlane.xlu0 %604 }
 0x140   : >> { %v620_v57 = vmul.f32 %v3123_v49, %v605_v56 }
 0x142   : >> { %v3135_v59 = vsub.f32 %v2911_v29, %v620_v57 }
 0x144   : >> { %v626_v61 = vmul.f32 %v3135_v59, %v3135_v59 }
 0x146   : >> { %v629_v62 = vsel %vm529_vm0, %v626_v61, 0.0 }
 0x147   : >> { %630 = vadd.xlane.f32.xlu2 %v629_v62 }
 0x14f   : >> { %633 = vadd.xlane.f32.xlu2 %v632_v0 }
 0x1b2   : >> { %v637_v16 = vpop.xlane.xlu1 %636 }
 0x1b3   : >> { %v640_v17 = vmul.f32 %v637_v16, %v3123_v49 }
 0x1b5   : >> { %v643_v21 = vadd.f32 1e-06, %v640_v17 }
 0x1b7   : >> { %2745 = vrsqrt.f32 %v643_v21  ;;  %vm670_vm4 = vweird.f32 %v643_v21 }
 0x1ba   : >> { %v631_v27 = vpop.xlane.xlu2 %630 }
 0x1bb   : >> { %v638_v30 = vmul.f32 %v631_v27, %v3123_v49 }
 0x1bd   : >> { %v2746_v31 = vpop.eup %2745  ;;  %v641_v32 = vadd.f32 1e-06, %v638_v30 }
 0x1be   : >> { %v665_v33 = vmul.f32 %v2746_v31, %v643_v21  ;;  %vm671_vm3 = vweird.f32 %v2746_v31  ;;  %v585_v21 = vld [vmem:[%s3179_s16 + $0x8] sm:$0xff] }
 0x1bf   : >> { %2747 = vrsqrt.f32 %v641_v32  ;;  %vm672_vm5 = vmor %vm670_vm4, %vm671_vm3  ;;  %vm650_vm7 = vweird.f32 %v641_v32  ;;  %v699_v22 = vperm.slane %v585_v21, 2  ;;  %vm1250_vm3 = vcmask 392192  }
 0x1c0   : >> { %v666_v34 = vmul.f32 %v2746_v31, %v665_v33  ;;  %vm1378_vm4 = vcmask 1043456  }
 0x1c2   : >> { %v667_v35 = vmul.f32 0.5, %v666_v34  ;;  %v634_v36 = vpop.xlane.xlu2 %633 }
 0x1c3   : >> { %v639_v39 = vmul.f32 %v634_v36, %v3123_v49 }
 0x1c4   : >> { %v668_v40 = vsub.f32 1.5, %v667_v35 }
 0x1c5   : >> { %v2748_v42 = vpop.eup %2747  ;;  %v642_v43 = vadd.f32 1e-06, %v639_v39 }
 0x1c6   : >> { %v669_v44 = vmul.f32 %v2746_v31, %v668_v40  ;;  %v645_v45 = vmul.f32 %v2748_v42, %v641_v32  ;;  %vm651_vm6 = vweird.f32 %v2748_v42 }
 0x1c7   : >> { %2749 = vrsqrt.f32 %v642_v43  ;;  %vm652_vm8 = vmor %vm650_vm7, %vm651_vm6  ;;  %vm660_vm10 = vweird.f32 %v642_v43 }
 0x1c8   : >> { %v646_v47 = vmul.f32 %v2748_v42, %v645_v45  ;;  %v673_v48 = vsel %vm672_vm5, %v2746_v31, %v669_v44  ;;  %vm1371_vm5 = vcmask 64512  }
 0x1c9   : >> { %v676_v50 = vmul.f32 %v673_v48, %v3127_v52 }
 0x1ca   : >> { %v647_v53 = vmul.f32 0.5, %v646_v47 }
 0x1cb   : >> { %v680_v54 = vmul.f32 %v677_v46, %v676_v50 }
 0x1cc   : >> { %v648_v55 = vsub.f32 1.5, %v647_v53 }
 0x1cd   : >> { %v2750_v56 = vpop.eup %2749  ;;  %v684_v57 = vadd.f32 %v681_v51, %v680_v54 }
 0x1ce   : >> { %v649_v58 = vmul.f32 %v2748_v42, %v648_v55  ;;  %v655_v61 = vmul.f32 %v2750_v56, %v642_v43  ;;  %vm661_vm9 = vweird.f32 %v2750_v56 }
 0x1cf   : >> { %v686_v62 = vpack.c.bf16 %v684_v57, %v684_v57  ;;  %vm662_vm11 = vmor %vm660_vm10, %vm661_vm9 }
 0x1d0   : >> { %v656_v63 = vmul.f32 %v2750_v56, %v655_v61  ;;  %v653_v1 = vsel %vm652_vm8, %v2748_v42, %v649_v58 }
 0x1d1   : >> { %2379 = vmatmul.msk.bf16.vlgmr.msra.gmra.mxu2 %vm529_vm0, %v686_v62  ;;  %v674_v52 = vmul.f32 %v653_v1, %v3135_v59  ;;  %v698_v59 = vperm.slane %v3183_v41, 2 }
 0x1d2   : >> { %v657_v0 = vmul.f32 0.5, %v656_v63 }
 0x1d3   : >> { %v678_v6 = vmul.f32 %v677_v46, %v674_v52 }
 0x1d4   : >> { %v658_v2 = vsub.f32 1.5, %v657_v0 }
 0x1d5   : >> { %v682_v8 = vadd.f32 %v681_v51, %v678_v6 }
 0x1d6   : >> { %v659_v3 = vmul.f32 %v2750_v56, %v658_v2 }
 0x1d8   : >> { %v663_v4 = vsel %vm662_vm11, %v2750_v56, %v659_v3 }
 0x1d9   : >> { %v675_v5 = vmul.f32 %v663_v4, %v3138_v60 }
 0x1db   : >> { %v679_v7 = vmul.f32 %v677_v46, %v675_v5 }
 0x1dd   : >> { %v683_v9 = vadd.f32 %v681_v51, %v679_v7 }
 0x1df   : >> { %v685_v10 = vpack.c.bf16 %v683_v9, %v682_v8 }
 0x1e1   : >> { %2378 = vmatmul.msk.bf16.vlgmr.msra.gmra.mxu0 %vm529_vm0, %v685_v10  ;;  %2380 = vmatmul.msk.bf16.vlgmr.msra.gmra.mxu1 %vm529_vm0, %v685_v10 }
 0x1f1   : >> { %2381 = vmatmul.msk.bf16.gmra.mxu1 %vm529_vm0, %v686_v62 }
 0x254   : >> { %v760_v11 = vpop.f32.mrf.mxu2 }
 0x255   : >> { %v761_v12 = vadd.f32 %v760_v11, %v698_v59 }
 0x257   : >> { %v3195_v13 = vpack.c.bf16 %v761_v12, %v761_v12 }
 0x259   : >> { %790 = vrot.lane.b32.xlu0 %v3195_v13, %s2918_s17 }
 0x25c   : >> { %v762_v60 = vpop.f32.mrf.mxu2 }
 0x25e   : >> { %v755_v14 = vpop.f32.mrf.mxu0  ;;  %v773_v15 = vpop.f32.mrf.mxu1 }
 0x25f   : >> { %v756_v18 = vadd.f32 %v755_v14, %v698_v59  ;;  %v774_v31 = vadd.f32 %v773_v15, %v699_v22 }
 0x266   : >> { %v757_v16 = vpop.f32.mrf.mxu0  ;;  %v775_v17 = vpop.f32.mrf.mxu1 }
 0x267   : >> { %v758_v19 = vadd.f32 %v757_v16, %v698_v59  ;;  %v776_v28 = vadd.f32 %v775_v17, %v699_v22 }
 0x269   : >> { %v3198_v20 = vpack.c.bf16 %v758_v19, %v756_v18  ;;  %v3208_v33 = vpack.c.bf16 %v776_v28, %v774_v31 }
 0x26b   : >> { %788 = vrot.lane.b32.xlu1 %v3198_v20, %s2918_s17  ;;  %s3716_s17 = sshll.u32 %s2915_s27, 6 }
 0x26e   : >> { %v778_v23 = vpop.f32.mrf.mxu1 }
 0x26f   : >> { %v779_v24 = vadd.f32 %v778_v23, %v699_v22 }
 0x271   : >> { %v3204_v27 = vpack.c.bf16 %v779_v24, %v779_v24 }
 0x273   : >> { %v870_v30 = vand.u32 %v3202_v26, %v3204_v27 }
 0x275   : >> { %878 = vmatpush.bf16.msra.mxu3 %v870_v30 }
 0x276   : >> { %v780_v32 = vpop.f32.mrf.mxu1 }
 0x279   : >> { %879 = vmatpush.bf16.msra.mxu3 %v3208_v33 }
 0x2cb   : >> { %v791_v34 = vpop.permute.xlu0 %790 }
 0x2cc   : >> { %v803_v35 = vsel %vm792_vm13, %v791_v34, 0 }
 0x2cd   : >> { %811 = vmatpush.bf16.xpose.msrb.mxu2 %v803_v35 }
 0x2dd   : >> { %v789_v36 = vpop.permute.xlu1 %788 }
 0x2de   : >> { %v800_v39 = vsel %vm792_vm13, %v789_v36, 0 }
 0x2df   : >> { %812 = vmatpush.bf16.xpose.msrb.mxu2 %v800_v39 }
 0x2e6   : >> { %2382 = vmatmul.msk.bf16.vlgmr.msrb.gmra.mxu2 %vm792_vm13, %v3198_v20 }
 0x2f6   : >> { %2383 = vmatmul.msk.bf16.gmra.mxu2 %vm792_vm13, %v3195_v13 }
 0x369   : >> { %v814_v40 = vpop.f32.mrf.mxu2 }
 0x36a   : >> { %v824_v42 = vsel %vm823_vm14, %v814_v40, -inf }
 0x36b   : >> { %825 = vmax.xlane.f32.xlu2 %v824_v42 }
 0x371   : >> { %v816_v43 = vpop.f32.mrf.mxu2 }
 0x372   : >> { %v827_v44 = vsel %vm823_vm14, %v816_v43, -inf }
 0x373   : >> { %828 = vmax.xlane.f32.xlu2 %v827_v44 }
 0x379   : >> { %v819_v45 = vpop.f32.mrf.mxu2 }
 0x37a   : >> { %v831_v46 = vsel %vm830_vm15, %v819_v45, -inf }
 0x37b   : >> { %832 = vmax.xlane.f32.xlu2 %v831_v46 }
 0x381   : >> { %v821_v47 = vpop.f32.mrf.mxu2 }
 0x3de   : >> { %v826_v48 = vpop.xlane.xlu2 %825 }
 0x3df   : >> { %v834_v50 = vsub.f32 %v814_v40, %v826_v48 }
 0x3e1   : >> { %v837_v51 = vmul.f32 1.442695, %v834_v50 }
 0x3e3   : >> { %2751 = vpow2.f32 %v837_v51 }
 0x3e6   : >> { %v829_v53 = vpop.xlane.xlu2 %828 }
 0x3e7   : >> { %v835_v54 = vsub.f32 %v816_v43, %v829_v53 }
 0x3e9   : >> { %v2752_v55 = vpop.eup %2751  ;;  %v839_v56 = vmul.f32 1.442695, %v835_v54 }
 0x3ea   : >> { %v843_v57 = vsel %vm823_vm14, %v2752_v55, 0.0 }
 0x3eb   : >> { %2753 = vpow2.f32 %v839_v56  ;;  %844 = vadd.xlane.f32.xlu0 %v843_v57 }
 0x3ee   : >> { %v833_v58 = vpop.xlane.xlu2 %832 }
 0x3ef   : >> { %v836_v61 = vsub.f32 %v819_v45, %v833_v58 }
 0x3f1   : >> { %v2754_v62 = vpop.eup %2753  ;;  %v841_v63 = vmul.f32 1.442695, %v836_v61 }
 0x3f2   : >> { %v846_v0 = vsel %vm823_vm14, %v2754_v62, 0.0 }
 0x3f3   : >> { %2755 = vpow2.f32 %v841_v63  ;;  %847 = vadd.xlane.f32.xlu2 %v846_v0 }
 0x3f9   : >> { %v2756_v1 = vpop.eup %2755 }
 0x3fa   : >> { %v849_v2 = vsel %vm830_vm15, %v2756_v1, 0.0 }
 0x3fb   : >> { %850 = vadd.xlane.f32.xlu1 %v849_v2 }
 0x3ff   : >> { %890 = vrot.lane.b32.xlu0 %v3198_v20, %s2920_s15 }
 0x407   : >> { %1106 = vrot.lane.b32.xlu0 %v3198_v20, %s2921_s20 }
 0x40b   : >> { %896 = vrot.lane.b32.xlu2 %v3195_v13, %s2922_s26 }
 0x40f   : >> { %1102 = vrot.lane.b32.xlu0 %v3198_v20, %s2923_s30 }
 0x413   : >> { %894 = vrot.lane.b32.xlu2 %v3198_v20, %s2922_s26 }
 0x414   : >> { %892 = vrot.lane.b32.xlu1 %v3195_v13, %s2920_s15 }
 0x41b   : >> { %1003 = vrot.lane.b32.xlu2 %v3195_v13, %s2924_s23 }
 0x41c   : >> { %999 = vrot.lane.b32.xlu1 %v3195_v13, %s2925_s28 }
 0x423   : >> { %1108 = vrot.lane.b32.xlu2 %v3195_v13, %s2921_s20 }
 0x42b   : >> { %1001 = vrot.lane.b32.xlu2 %v3198_v20, %s2924_s23 }
 0x433   : >> { %997 = vrot.lane.b32.xlu2 %v3198_v20, %s2925_s28 }
 0x43b   : >> { %1104 = vrot.lane.b32.xlu2 %v3195_v13, %s2923_s30 }
 0x45e   : >> { %v845_v52 = vpop.xlane.xlu0 %844 }
 0x45f   : >> { %2757 = vrcp.f32 %v845_v52 }
 0x465   : >> { %v2758_v4 = vpop.eup %2757 }
 0x466   : >> { %v848_v3 = vpop.xlane.xlu2 %847  ;;  %v855_v7 = vmul.f32 %v2758_v4, %v2752_v55 }
 0x467   : >> { %2759 = vrcp.f32 %v848_v3 }
 0x46d   : >> { %v2760_v5 = vpop.eup %2759 }
 0x46e   : >> { %v897_v6 = vpop.permute.xlu2 %896  ;;  %v856_v8 = vmul.f32 %v2760_v5, %v2754_v62  ;;  %v851_v10 = vpop.xlane.xlu1 %850 }
 0x46f   : >> { %v908_v9 = vsel %vm792_vm13, %v897_v6, 0  ;;  %2761 = vrcp.f32 %v851_v10 }
 0x470   : >> { %916 = vmatpush.bf16.xpose.msrb.mxu3 %v908_v9  ;;  %v858_v59 = vpack.c.bf16 %v856_v8, %v855_v7 }
 0x471   : >> { %v891_v17 = vpop.permute.xlu0 %890 }
 0x472   : >> { %2384 = vmatmul.msk.bf16.vlgmr.msra.gmra.mxu3 %vm823_vm14, %v858_v59 }
 0x475   : >> { %v2762_v13 = vpop.eup %2761 }
 0x476   : >> { %v895_v11 = vpop.permute.xlu2 %894  ;;  %v857_v60 = vmul.f32 %v2762_v13, %v2756_v1 }
 0x477   : >> { %v905_v12 = vsel %vm792_vm13, %v895_v11, 0 }
 0x478   : >> { %917 = vmatpush.bf16.xpose.msrb.mxu3 %v905_v12  ;;  %v859_v16 = vpack.c.bf16 %v857_v60, %v857_v60 }
 0x479   : >> { %v1107_v20 = vpop.permute.xlu0 %1106 }
 0x47a   : >> { %v1117_v22 = vsel %vm792_vm13, %v1107_v20, 0 }
 0x47e   : >> { %v1004_v14 = vpop.permute.xlu2 %1003 }
 0x47f   : >> { %v1015_v15 = vsel %vm792_vm13, %v1004_v14, 0 }
 0x480   : >> { %1023 = vmatpush.bf16.xpose.msrb.mxu1 %v1015_v15 }
 0x481   : >> { %v1103_v30 = vpop.permute.xlu0 %1102 }
 0x482   : >> { %2385 = vmatmul.msk.bf16.gmra.mxu3 %vm823_vm14, %v859_v16 }
 0x486   : >> { %v1109_v18 = vpop.permute.xlu2 %1108  ;;  %v893_v25 = vpop.permute.xlu1 %892 }
 0x487   : >> { %v1120_v19 = vsel %vm792_vm13, %v1109_v18, 0 }
 0x488   : >> { %1128 = vmatpush.bf16.xpose.msra.mxu3 %v1120_v19 }
 0x48e   : >> { %v1002_v21 = vpop.permute.xlu2 %1001  ;;  %v1000_v28 = vpop.permute.xlu1 %999 }
 0x48f   : >> { %v1012_v23 = vsel %vm792_vm13, %v1002_v21, 0 }
 0x490   : >> { %1024 = vmatpush.bf16.xpose.msrb.mxu1 %v1012_v23  ;;  %1129 = vmatpush.bf16.xpose.msra.mxu3 %v1117_v22 }
 0x492   : >> { %2386 = vmatmul.msk.bf16.vlgmr.msrb.gmra.mxu3 %vm792_vm13, %v891_v17 }
 0x496   : >> { %v998_v24 = vpop.permute.xlu2 %997 }
 0x497   : >> { %2390 = vmatmul.msk.bf16.vlgmr.msrb.gmra.mxu1 %vm792_vm13, %v998_v24 }
 0x49e   : >> { %v1105_v31 = vpop.permute.xlu2 %1104 }
 0x4a2   : >> { %2387 = vmatmul.msk.bf16.gmra.mxu3 %vm792_vm13, %v893_v25 }
 0x4a7   : >> { %2391 = vmatmul.msk.bf16.gmra.mxu1 %vm792_vm13, %v1000_v28 }
 0x4b2   : >> { %2394 = vmatmul.msk.bf16.vlgmr.msra.gmra.mxu3 %vm792_vm13, %v1103_v30 }
 0x4c2   : >> { %2395 = vmatmul.msk.bf16.gmra.mxu3 %vm792_vm13, %v1105_v31 }
 0x4f5   : >> { %v3261_v32 = vpop.f32.mrf.mxu3 }
 0x4fd   : >> { %v3263_v34 = vpop.f32.mrf.mxu3 }
 0x505   : >> { %v3265_v35 = vpop.f32.mrf.mxu3 }
 0x50d   : >> { %v888_v36 = vpop.f32.mrf.mxu3 }
 0x514   : >> { %v1026_v39 = vpop.f32.mrf.mxu1 }
 0x515   : >> { %v919_v40 = vpop.f32.mrf.mxu3  ;;  %v1035_v42 = vsel %vm823_vm14, %v1026_v39, -inf }
 0x516   : >> { %1036 = vmax.xlane.f32.xlu0 %v1035_v42  ;;  %v928_v45 = vsel %vm823_vm14, %v919_v40, -inf }
 0x51c   : >> { %v1028_v43 = vpop.f32.mrf.mxu1 }
 0x51d   : >> { %v921_v44 = vpop.f32.mrf.mxu3  ;;  %v1038_v46 = vsel %vm823_vm14, %v1028_v43, -inf }
 0x51e   : >> { %929 = vmax.xlane.f32.xlu0 %v928_v45  ;;  %1039 = vmax.xlane.f32.xlu1 %v1038_v46  ;;  %v931_v50 = vsel %vm823_vm14, %v921_v44, -inf }
 0x524   : >> { %v3270_v47 = vpop.f32.mrf.mxu1 }
 0x525   : >> { %v924_v48 = vpop.f32.mrf.mxu3 }
 0x526   : >> { %932 = vmax.xlane.f32.xlu1 %v931_v50  ;;  %v934_v59 = vsel %vm830_vm15, %v924_v48, -inf }
 0x52c   : >> { %v1033_v51 = vpop.f32.mrf.mxu1 }
 0x52d   : >> { %v926_v53 = vpop.f32.mrf.mxu3 }
 0x532   : >> { %967 = vrot.lane.b32.xlu0 %v3204_v27, %s2920_s15 }
 0x535   : >> { %v3275_v54 = vpop.f32.mrf.mxu3 }
 0x536   : >> { %v1140_v15 = vsel %vm823_vm14, %v3275_v54, -inf }
 0x53d   : >> { %v3277_v55 = vpop.f32.mrf.mxu3 }
 0x53e   : >> { %v1143_v58 = vsel %vm823_vm14, %v3277_v55, -inf }
 0x53f   : >> { %965 = vrot.lane.b32.xlu1 %v3208_v33, %s2920_s15 }
 0x545   : >> { %v3281_v56 = vpop.f32.mrf.mxu3 }
 0x546   : >> { %v1146_v19 = vsel %vm830_vm15, %v3281_v56, -inf }
 0x54d   : >> { %v1138_v57 = vpop.f32.mrf.mxu3 }
 0x55c   : >> { %1144 = vmax.xlane.f32.xlu0 %v1143_v58 }
 0x589   : >> { %v1037_v61 = vpop.xlane.xlu0 %1036 }
 0x58a   : >> { %v1044_v62 = vsub.f32 %v1026_v39, %v1037_v61 }
 0x58c   : >> { %v1047_v63 = vmul.f32 1.442695, %v1044_v62 }
 0x58e   : >> { %2763 = vpow2.f32 %v1047_v63 }
 0x591   : >> { %v930_v0 = vpop.xlane.xlu0 %929  ;;  %v1040_v1 = vpop.xlane.xlu1 %1039 }
 0x592   : >> { %v937_v2 = vsub.f32 %v919_v40, %v930_v0  ;;  %v1045_v52 = vsub.f32 %v1028_v43, %v1040_v1 }
 0x594   : >> { %v2764_v3 = vpop.eup %2763  ;;  %v940_v4 = vmul.f32 1.442695, %v937_v2  ;;  %v1049_v5 = vmul.f32 1.442695, %v1045_v52 }
 0x595   : >> { %v1053_v6 = vsel %vm823_vm14, %v2764_v3, 0.0 }
 0x596   : >> { %2765 = vpow2.f32 %v940_v4  ;;  %1054 = vadd.xlane.f32.xlu2 %v1053_v6 }
 0x597   : >> { %2767 = vpow2.f32 %v1049_v5  ;;  %v1041_v5 = vsel %vm830_vm15, %v3270_v47, -inf }
 0x599   : >> { %v933_v7 = vpop.xlane.xlu1 %932 }
 0x59a   : >> { %v938_v9 = vsub.f32 %v921_v44, %v933_v7 }
 0x59c   : >> { %v2766_v8 = vpop.eup %2765  ;;  %v942_v13 = vmul.f32 1.442695, %v938_v9 }
 0x59d   : >> { %v2768_v10 = vpop.eup %2767  ;;  %v946_v11 = vsel %vm823_vm14, %v2766_v8, 0.0 }
 0x59e   : >> { %935 = vmax.xlane.f32.xlu2 %v934_v59  ;;  %947 = vadd.xlane.f32.xlu1 %v946_v11  ;;  %v1056_v12 = vsel %vm823_vm14, %v2768_v10, 0.0  ;;  %2769 = vpow2.f32 %v942_v13 }
 0x59f   : >> { %1057 = vadd.xlane.f32.xlu0 %v1056_v12 }
 0x5a4   : >> { %v968_v60 = vpop.permute.xlu0 %967  ;;  %v2770_v16 = vpop.eup %2769 }
 0x5a5   : >> { %v977_v14 = vand.u32 %v968_v60, %v3202_v26  ;;  %v949_v17 = vsel %vm823_vm14, %v2770_v16, 0.0 }
 0x5a6   : >> { %1141 = vmax.xlane.f32.xlu2 %v1140_v15 }
 0x5a7   : >> { %985 = vmatpush.bf16.msrb.mxu0 %v977_v14 }
 0x5ae   : >> { %950 = vadd.xlane.f32.xlu2 %v949_v17 }
 0x5b1   : >> { %v966_v18 = vpop.permute.xlu1 %965 }
 0x5b2   : >> { %986 = vmatpush.bf16.msrb.mxu0 %v966_v18 }
 0x5b3   : >> { %1070 = vrot.lane.b32.xlu0 %v3208_v33, %s2925_s28 }
 0x5bb   : >> { %1175 = vrot.lane.b32.xlu0 %v3208_v33, %s2923_s30 }
 0x5cf   : >> { %v1145_v21 = vpop.xlane.xlu0 %1144 }
 0x5d0   : >> { %v1150_v62 = vsub.f32 %v3277_v55, %v1145_v21 }
 0x5d2   : >> { %v1154_v63 = vmul.f32 1.442695, %v1150_v62 }
 0x5e5   : >> { %1147 = vmax.xlane.f32.xlu0 %v1146_v19 }
 0x609   : >> { %v1055_v20 = vpop.xlane.xlu2 %1054 }
 0x60a   : >> { %2771 = vrcp.f32 %v1055_v20 }
 0x610   : >> { %v2772_v28 = vpop.eup %2771 }
 0x611   : >> { %v936_v22 = vpop.xlane.xlu2 %935  ;;  %v1065_v36 = vmul.f32 %v2772_v28, %v2764_v3  ;;  %v948_v44 = vpop.xlane.xlu1 %947 }
 0x612   : >> { %v1058_v23 = vpop.xlane.xlu0 %1057  ;;  %v939_v24 = vsub.f32 %v924_v48, %v936_v22 }
 0x613   : >> { %2773 = vrcp.f32 %v1058_v23 }
 0x614   : >> { %v944_v25 = vmul.f32 1.442695, %v939_v24 }
 0x616   : >> { %2775 = vpow2.f32 %v944_v25 }
 0x619   : >> { %v2774_v30 = vpop.eup %2773  ;;  %v1142_v31 = vpop.xlane.xlu2 %1141 }
 0x61a   : >> { %v1066_v39 = vmul.f32 %v2774_v30, %v2768_v10  ;;  %v1149_v33 = vsub.f32 %v3275_v54, %v1142_v31 }
 0x61c   : >> { %v2776_v40 = vpop.eup %2775  ;;  %v1068_v42 = vpack.c.bf16 %v1066_v39, %v1065_v36  ;;  %v1152_v43 = vmul.f32 1.442695, %v1149_v33 }
 0x61d   : >> { %v952_v45 = vsel %vm830_vm15, %v2776_v40, 0.0 }
 0x61e   : >> { %2777 = vpow2.f32 %v1152_v43  ;;  %953 = vadd.xlane.f32.xlu2 %v952_v45 }
 0x61f   : >> { %2779 = vrcp.f32 %v948_v44 }
 0x621   : >> { %v951_v46 = vpop.xlane.xlu2 %950 }
 0x622   : >> { %2781 = vrcp.f32 %v951_v46 }
 0x623   : >> { %2783 = vpow2.f32 %v1154_v63  ;;  %v3335_v63 = vld [vmem:[%s589_s19 + $0x18] sm:$0xff] }
 0x624   : >> { %v2778_v48 = vpop.eup %2777 }
 0x625   : >> { %v1158_v50 = vsel %vm823_vm14, %v2778_v48, 0.0  ;;  %v2780_v51 = vpop.eup %2779  ;;  %v1071_v61 = vpop.permute.xlu0 %1070 }
 0x626   : >> { %1159 = vadd.xlane.f32.xlu1 %v1158_v50  ;;  %v958_v57 = vmul.f32 %v2780_v51, %v2766_v8 }
 0x628   : >> { %v2782_v53 = vpop.eup %2781 }
 0x629   : >> { %v959_v58 = vmul.f32 %v2782_v53, %v2770_v16  ;;  %v2784_v2 = vpop.eup %2783 }
 0x62a   : >> { %v1161_v3 = vsel %vm823_vm14, %v2784_v2, 0.0 }
 0x62b   : >> { %v961_v54 = vpack.c.bf16 %v959_v58, %v958_v57 }
 0x62d   : >> { %2388 = vmatmul.msk.bf16.vlgmr.msrb.gmra.mxu0 %vm823_vm14, %v961_v54  ;;  %v1176_v0 = vpop.permute.xlu0 %1175 }
 0x636   : >> { %1072 = vrot.lane.b32.xlu2 %v3204_v27, %s2925_s28  ;;  %s2926_s28 = smov 120  }
 0x63f   : >> { %1177 = vrot.lane.b32.xlu1 %v3204_v27, %s2923_s30  ;;  %s3410_s30 = scalar_lea.vmem %s3701_s8, %s3716_s17 }
 0x658   : >> { %v1148_v1 = vpop.xlane.xlu0 %1147 }
 0x659   : >> { %v1151_v52 = vsub.f32 %v3281_v56, %v1148_v1 }
 0x65b   : >> { %v1156_v4 = vmul.f32 1.442695, %v1151_v52 }
 0x65d   : >> { %2785 = vpow2.f32 %v1156_v4 }
 0x65f   : >> { %1162 = vadd.xlane.f32.xlu2 %v1161_v3 }
 0x663   : >> { %v2786_v27 = vpop.eup %2785 }
 0x664   : >> { %v1164_v6 = vsel %vm830_vm15, %v2786_v27, 0.0 }
 0x667   : >> { %1042 = vmax.xlane.f32.xlu2 %v1041_v5 }
 0x66f   : >> { %1165 = vadd.xlane.f32.xlu2 %v1164_v6 }
 0x691   : >> { %v954_v55 = vpop.xlane.xlu2 %953 }
 0x692   : >> { %2787 = vrcp.f32 %v954_v55 }
 0x698   : >> { %v2788_v7 = vpop.eup %2787 }
 0x699   : >> { %v1073_v8 = vpop.permute.xlu2 %1072  ;;  %v960_v9 = vmul.f32 %v2788_v7, %v2776_v40  ;;  %v1160_v59 = vpop.xlane.xlu1 %1159 }
 0x69a   : >> { %v1082_v56 = vand.u32 %v1073_v8, %v3202_v26  ;;  %2789 = vrcp.f32 %v1160_v59 }
 0x69b   : >> { %v962_v10 = vpack.c.bf16 %v960_v9, %v960_v9 }
 0x69c   : >> { %1090 = vmatpush.bf16.msra.mxu2 %v1082_v56 }
 0x69d   : >> { %2389 = vmatmul.msk.bf16.gmra.mxu0 %vm823_vm14, %v962_v10 }
 0x6a0   : >> { %1091 = vmatpush.bf16.msra.mxu2 %v1071_v61  ;;  %v2790_v16 = vpop.eup %2789 }
 0x6a1   : >> { %v1170_v18 = vmul.f32 %v2790_v16, %v2778_v48 }
 0x6a3   : >> { %2392 = vmatmul.msk.bf16.vlgmr.msra.gmra.mxu2 %vm823_vm14, %v1068_v42 }
 0x6a4   : >> { %1351 = vmatpush.bf16.msrb.mxu2 %v3335_v63 }
 0x6aa   : >> { %v988_v11 = vpop.f32.mrf.mxu0 }
 0x6b1   : >> { %v1178_v12 = vpop.permute.xlu1 %1177 }
 0x6b2   : >> { %v1187_v13 = vand.u32 %v1178_v12, %v3202_v26  ;;  %v990_v60 = vpop.f32.mrf.mxu0  ;;  %v3354_v12 = vld [vmem:[%s589_s19] sm:$0xff] }
 0x6b3   : >> { %v2728_v14 = vpack.i.bf16 %v990_v60, %v988_v11  ;;  %v3348_v11 = vld [vmem:[%s589_s19 + $0x10] sm:$0xff] }
 0x6b4   : >> { %1195 = vmatpush.bf16.msra.mxu0 %v1187_v13  ;;  %1352 = vmatpush.bf16.msrb.mxu2 %v3348_v11 }
 0x6b5   : >> { %2729 = vrot.lane.b32.xlu2 %v2728_v14, %s2921_s20 }
 0x6b8   : >> { %1196 = vmatpush.bf16.msra.mxu0 %v1176_v0 }
 0x6d2   : >> { %v1163_v15 = vpop.xlane.xlu2 %1162 }
 0x6d3   : >> { %2791 = vrcp.f32 %v1163_v15 }
 0x6d9   : >> { %v2792_v17 = vpop.eup %2791 }
 0x6da   : >> { %v1171_v19 = vmul.f32 %v2792_v17, %v2784_v2  ;;  %v1043_v20 = vpop.xlane.xlu2 %1042 }
 0x6db   : >> { %v1046_v21 = vsub.f32 %v3270_v47, %v1043_v20 }
 0x6dc   : >> { %v1173_v22 = vpack.c.bf16 %v1171_v19, %v1170_v18 }
 0x6dd   : >> { %v1051_v23 = vmul.f32 1.442695, %v1046_v21 }
 0x6de   : >> { %2396 = vmatmul.msk.bf16.vlgmr.msra.gmra.mxu0 %vm823_vm14, %v1173_v22 }
 0x6df   : >> { %2793 = vpow2.f32 %v1051_v23 }
 0x6e2   : >> { %v1166_v26 = vpop.xlane.xlu2 %1165 }
 0x6e3   : >> { %2795 = vrcp.f32 %v1166_v26 }
 0x6e5   : >> { %v2794_v24 = vpop.eup %2793 }
 0x6e6   : >> { %v1059_v25 = vsel %vm830_vm15, %v2794_v24, 0.0 }
 0x6e7   : >> { %1060 = vadd.xlane.f32.xlu1 %v1059_v25 }
 0x6e9   : >> { %v2796_v28 = vpop.eup %2795 }
 0x6ea   : >> { %v1172_v30 = vmul.f32 %v2796_v28, %v2786_v27  ;;  %v1316_v28 = vperm.slane %v3183_v41, 3 }
 0x6ec   : >> { %v1174_v31 = vpack.c.bf16 %v1172_v30, %v1172_v30 }
 0x6ee   : >> { %2397 = vmatmul.msk.bf16.gmra.mxu0 %vm823_vm14, %v1174_v31 }
 0x70f   : >> { %v2730_v62 = vpop.permute.xlu2 %2729 }
 0x710   : >> { %v2732_v1 = vunpack.i.h.bf16 %v2730_v62  ;;  %v2731_v2 = vunpack.i.l.bf16 %v2730_v62 }
 0x712   : >> { %v1244_v5 = vsel %vm792_vm13, %v3263_v34, %v2732_v1  ;;  %v1243_v27 = vsel %vm792_vm13, %v3261_v32, %v2731_v2  ;;  %v3351_v32 = vld [vmem:[%s589_s19 + $0x8] sm:$0xff]  ;;  %s2589_s19 = sshll.u32 %s2915_s27, 3 }
 0x713   : >> { %1353 = vmatpush.bf16.msrb.mxu2 %v3351_v32 }
 0x717   : >> { %1354 = vmatpush.bf16.msrb.mxu2 %v3354_v12 }
 0x71a   : >> { %v993_v36 = vpop.f32.mrf.mxu0 }
 0x722   : >> { %v995_v39 = vpop.f32.mrf.mxu0 }
 0x726   : >> { %v1093_v33 = vpop.f32.mrf.mxu2 }
 0x72e   : >> { %v1095_v47 = vpop.f32.mrf.mxu2 }
 0x72f   : >> { %v2733_v40 = vpack.i.bf16 %v1095_v47, %v1093_v33 }
 0x731   : >> { %2734 = vrot.lane.b32.xlu2 %v2733_v40, %s2924_s23 }
 0x739   : >> { %1214 = vrot.lane.b32.xlu2 %v993_v36, %s2921_s20  ;;  %s1257_s20 = scalar_lea.vmem %s3700_s7, %s3173_s29 }
 0x73a   : >> { %v2603_v57 = vld [vmem:[%s1257_s20 + $0x18] sm:$0xff]  ;;  %v2602_v58 = vld [vmem:[%s1257_s20 + $0x10] sm:$0xff]  ;;  %v2601_v54 = vld [vmem:[%s1257_s20 + $0x8] sm:$0xff] }
 0x73b   : >> { %1300 = vmatpush.bf16.msra.mxu1 %v2603_v57  ;;  %v2600_v61 = vld [vmem:[%s1257_s20] sm:$0xff] }
 0x73f   : >> { %1301 = vmatpush.bf16.msra.mxu1 %v2602_v58 }
 0x743   : >> { %1302 = vmatpush.bf16.msra.mxu1 %v2601_v54 }
 0x747   : >> { %1303 = vmatpush.bf16.msra.mxu1 %v2600_v61 }
 0x75a   : >> { %v1061_v42 = vpop.xlane.xlu1 %1060 }
 0x75b   : >> { %2797 = vrcp.f32 %v1061_v42  ;;  %v1198_v43 = vpop.f32.mrf.mxu0 }
 0x761   : >> { %v2798_v44 = vpop.eup %2797 }
 0x762   : >> { %v1067_v45 = vmul.f32 %v2798_v44, %v2794_v24 }
 0x763   : >> { %v1200_v46 = vpop.f32.mrf.mxu0 }
 0x764   : >> { %v2738_v48 = vpack.i.bf16 %v1200_v46, %v1198_v43  ;;  %v1069_v50 = vpack.c.bf16 %v1067_v45, %v1067_v45  ;;  %v1370_v46 = vperm.slane %v3183_v41, 4 }
 0x766   : >> { %2739 = vrot.lane.b32.xlu0 %v2738_v48, %s2922_s26  ;;  %2393 = vmatmul.msk.bf16.gmra.mxu2 %vm823_vm14, %v1069_v50 }
 0x76b   : >> { %v1203_v51 = vpop.f32.mrf.mxu0 }
 0x76c   : >> { %1238 = vrot.lane.b32.xlu2 %v1203_v51, %s2922_s26 }
 0x773   : >> { %v1205_v53 = vpop.f32.mrf.mxu0 }
 0x78b   : >> { %v2735_v0 = vpop.permute.xlu2 %2734 }
 0x78c   : >> { %v2737_v52 = vunpack.i.h.bf16 %v2735_v0  ;;  %v2736_v3 = vunpack.i.l.bf16 %v2735_v0 }
 0x78e   : >> { %v1248_v7 = vsel %vm1246_vm2, %v1244_v5, %v2737_v52  ;;  %v1247_v8 = vsel %vm1246_vm2, %v1243_v27, %v2736_v3 }
 0x793   : >> { %v1215_v13 = vpop.permute.xlu2 %1214 }
 0x794   : >> { %v1245_v14 = vsel %vm792_vm13, %v3265_v35, %v1215_v13  ;;  %v2466_v13 = vld [vmem:[%s3410_s30 + $0x38] sm:$0xf0] }
 0x7c6   : >> { %v1239_v16 = vpop.permute.xlu2 %1238 }
 0x7d8   : >> { %v2740_v4 = vpop.permute.xlu0 %2739 }
 0x7d9   : >> { %v2742_v6 = vunpack.i.h.bf16 %v2740_v4  ;;  %v2741_v55 = vunpack.i.l.bf16 %v2740_v4 }
 0x7db   : >> { %v1251_v9 = vsel %vm1250_vm3, %v1247_v8, %v2741_v55  ;;  %v1252_v56 = vsel %vm1250_vm3, %v1248_v7, %v2742_v6 }
 0x7dc   : >> { %v1254_v10 = vpack.c.bf16 %v1252_v56, %v1251_v9  ;;  %v2464_v56 = vld [vmem:[%s3410_s30 + $0x30] sm:$0xf] }
 0x7de   : >> { %2415 = vmatmul.msk.bf16.vlgmr.msra.gmra.mxu1 %vm529_vm0, %v1254_v10  ;;  %v2612_v10 = vld [vmem:[%s3410_s30 + $0x34] sm:$0xf0] }
 0x7e9   : >> { %v1098_v59 = vpop.f32.mrf.mxu2 }
 0x7ea   : >> { %1226 = vrot.lane.b32.xlu1 %v1098_v59, %s2924_s23  ;;  %s3367_s23 = scalar_lea.vmem %s3704_s11, %s2589_s19  ;;  %v2611_v59 = vld [vmem:[%s3410_s30 + $0x34] sm:$0xf]  ;;  %s2613_s19 = sshll.u32 %s2915_s27, 7 }
 0x7eb   : >> { %v601_v35 = vld [vmem:[%s3367_s23] sm:$0xf]  ;;  %s3484_s17 = scalar_lea.vmem %s3702_s9, %s2613_s19  ;;  %s577_s27 = sadd.s32 1, %s2915_s27  }
 0x7ec   : >> { %v1380_v22 = vsel %vm1378_vm4, %v601_v35, 0  ;;  %p574_p11 = scmp.ge.s32.totalorder %s577_s27, 12  }
 0x7ed   : >> { %1389 = vmatpush.bf16.msrb.mxu3 %v1380_v22  ;;  %s2190_s15 = sshll.u32 (%p574_p11), %s3095_s18, 4  ;;  %s3720_s27 = sand.u32 (%p574_p11), 1, %s2891_s22   ;;  %s2191_s15 = int_to_ptr.vmem [resolvable:$true] %s2190_s15 }
 0x7ee   : > { %s2841_s26 = scalar_lea.hbm (%p574_p11), %s3705_s12, 2 }
 0x7f1   : >> { %v1100_v34 = vpop.f32.mrf.mxu2 }
 0x7f2   : >> { %v2465_v34 = vor.u32 %v2612_v10, %v2464_v56 }
 0x7f4   : >> { %1544 = vmatpush.bf16.msrb.mxu0 %v2465_v34 }
 0x85b   : >> { %v1305_v60 = vpop.f32.mrf.mxu1 }
 0x85c   : >> { %v1227_v15 = vpop.permute.xlu1 %1226 }
 0x85d   : >> { %v1249_v17 = vsel %vm1246_vm2, %v1245_v14, %v1227_v15  ;;  %v2469_v14 = vor.u32 %v2611_v59, %v2466_v13 }
 0x85e   : >> { %v1253_v18 = vsel %vm1250_vm3, %v1249_v17, %v1239_v16  ;;  %v2456_v16 = vld [vmem:[%s3410_s30 + $0x20] sm:$0xf]  ;;  %v2610_v17 = vld [vmem:[%s3410_s30 + $0x24] sm:$0xf0] }
 0x85f   : >> { %v1255_v19 = vpack.c.bf16 %v1253_v18, %v1253_v18  ;;  %1562 = vmatpush.bf16.msrb.mxu1 %v2469_v14  ;;  %v2609_v18 = vld [vmem:[%s3410_s30 + $0x24] sm:$0xf] }
 0x861   : >> { %2416 = vmatmul.msk.bf16.gmra.mxu1 %vm529_vm0, %v1255_v19 }
 0x863   : >> { %v1307_v20 = vpop.f32.mrf.mxu1 }
 0x864   : >> { %v1314_v21 = vpack.c.bf16 %v1307_v20, %v1305_v60 }
 0x866   : >> { %2433 = vmatmul.msk.bf16.vlgmr.msrb.gmra.mxu2 %vm529_vm0, %v1314_v21  ;;  %v2458_v21 = vld [vmem:[%s3410_s30 + $0x28] sm:$0xf0] }
 0x867   : >> { %v2461_v35 = vor.u32 %v2609_v18, %v2458_v21 }
 0x869   : >> { %1563 = vmatpush.bf16.msrb.mxu1 %v2461_v35 }
 0x8de   : >> { %v1310_v23 = vpop.f32.mrf.mxu1 }
 0x8df   : >> { %v1315_v26 = vpack.c.bf16 %v1310_v23, %v1310_v23 }
 0x8e1   : >> { %2434 = vmatmul.msk.bf16.gmra.mxu2 %vm529_vm0, %v1315_v26  ;;  %v2608_v26 = vld [vmem:[%s3410_s30 + $0x14] sm:$0xf0] }
 0x8e6   : >> { %v1312_v24 = vpop.f32.mrf.mxu1 }
 0x8e7   : >> { %v2607_v24 = vld [vmem:[%s3410_s30 + $0x14] sm:$0xf] }
 0x8e9   : >> { %v1356_v25 = vpop.f32.mrf.mxu2 }
 0x8ea   : >> { %v1357_v30 = vadd.f32 %v1356_v25, %v1316_v28 }
 0x8ec   : >> { %v1365_v39 = vmax.f32 %v1357_v30, 0.0  ;;  %v2450_v30 = vld [vmem:[%s3410_s30 + $0x18] sm:$0xf0] }
 0x8f1   : >> { %v1358_v31 = vpop.f32.mrf.mxu2 }
 0x8f2   : >> { %v1359_v36 = vadd.f32 %v1358_v31, %v1316_v28  ;;  %v2440_v31 = vld [vmem:[%s3410_s30] sm:$0xf] }
 0x8f4   : >> { %v1366_v33 = vmax.f32 %v1359_v36, 0.0 }
 0x8f6   : >> { %v1368_v47 = vpack.c.bf16 %v1366_v33, %v1365_v39  ;;  %v2453_v39 = vor.u32 %v2607_v24, %v2450_v30  ;;  %v2606_v33 = vld [vmem:[%s3410_s30 + $0x4] sm:$0xf0] }
 0x8f8   : >> { %2435 = vmatmul.msk.bf16.vlgmr.msrb.gmra.mxu3 %vm1371_vm5, %v1368_v47  ;;  %v2605_v47 = vld [vmem:[%s3410_s30 + $0x4] sm:$0xf]  ;;  %1564 = vmatpush.bf16.msrb.mxu1 %v2453_v39 }
 0x964   : >> { %v1361_v40 = vpop.f32.mrf.mxu2 }
 0x965   : >> { %v1362_v42 = vadd.f32 %v1361_v40, %v1316_v28  ;;  %v2442_v40 = vld [vmem:[%s3410_s30 + $0x8] sm:$0xf0] }
 0x967   : >> { %v1367_v43 = vmax.f32 %v1362_v42, 0.0 }
 0x969   : >> { %v1369_v44 = vpack.c.bf16 %v1367_v43, %v1367_v43  ;;  %v2441_v43 = vor.u32 %v2606_v33, %v2440_v31 }
 0x96b   : >> { %2436 = vmatmul.msk.bf16.gmra.mxu3 %vm1371_vm5, %v1369_v44  ;;  %v2445_v44 = vor.u32 %v2605_v47, %v2442_v40 }
 0x96c   : >> { %v1363_v45 = vpop.f32.mrf.mxu2 }
 0x96d   : >> { %1565 = vmatpush.bf16.msrb.mxu1 %v2445_v44 }
 0x97b   : >> { %v1391_v48 = vpop.f32.mrf.mxu3 }
 0x97c   : >> { %v1392_v50 = vadd.f32 %v1391_v48, %v1370_v46 }
 0x97e   : >> { %v1400_v51 = vadd.f32 %v1392_v50, %v1305_v60 }
 0x980   : >> { %v3377_v53 = vadd.f32 %v2911_v29, %v1400_v51 }
 0x982   : >> { %v1406_v57 = vsel %vm529_vm0, %v3377_v53, 0.0 }
 0x983   : >> { %v1393_v58 = vpop.f32.mrf.mxu3  ;;  %1407 = vadd.xlane.f32.xlu2 %v1406_v57 }
 0x984   : >> { %v1394_v54 = vadd.f32 %v1393_v58, %v1370_v46 }
 0x986   : >> { %v1401_v61 = vadd.f32 %v1394_v54, %v1307_v20  ;;  %v2457_v20 = vor.u32 %v2610_v17, %v2456_v16 }
 0x988   : >> { %v3382_v62 = vadd.f32 %v2907_v38, %v1401_v61  ;;  %1545 = vmatpush.bf16.msrb.mxu0 %v2457_v20 }
 0x98a   : >> { %v1409_v0 = vsel %vm529_vm0, %v3382_v62, 0.0 }
 0x98b   : >> { %1410 = vadd.xlane.f32.xlu0 %v1409_v0 }
 0x9ee   : >> { %v1396_v41 = vpop.f32.mrf.mxu3 }
 0x9ef   : >> { %v1397_v1 = vadd.f32 %v1396_v41, %v1370_v46 }
 0x9f1   : >> { %v1402_v2 = vadd.f32 %v1397_v1, %v1310_v23  ;;  %v2448_v23 = vld [vmem:[%s3410_s30 + $0x10] sm:$0xf]  ;;  %s2180_s30 = scalar_lea.sflag (%p574_p11), [#allocation3], %s3720_s27 }
 0x9f2   : >> { %v2449_v28 = vor.u32 %v2608_v26, %v2448_v23 }
 0x9f3   : >> { %v3387_v29 = vadd.f32 %v2903_v37, %v1402_v2 }
 0x9f4   : >> { %1546 = vmatpush.bf16.msrb.mxu0 %v2449_v28 }
 0x9f5   : >> { %v1412_v52 = vsel %vm609_vm1, %v3387_v29, 0.0 }
 0x9f6   : >> { %v1398_v3 = vpop.f32.mrf.mxu3  ;;  %1413 = vadd.xlane.f32.xlu1 %v1412_v52  ;;  %v1408_v4 = vpop.xlane.xlu2 %1407 }
 0x9f7   : >> { %v1415_v38 = vmul.f32 %v1408_v4, %v3123_v49 }
 0x9f8   : >> { %1547 = vmatpush.bf16.msrb.mxu0 %v2441_v43 }
 0x9f9   : >> { %v3393_v5 = vsub.f32 %v3377_v53, %v1415_v38 }
 0x9fb   : >> { %v1421_v27 = vmul.f32 %v3393_v5, %v3393_v5 }
 0x9fd   : >> { %v1424_v6 = vsel %vm529_vm0, %v1421_v27, 0.0  ;;  %v2817_v27 = vld [vmem:[%s3179_s16] sm:$0xff] }
 0x9fe   : >> { %v1411_v55 = vpop.xlane.xlu0 %1410  ;;  %1425 = vadd.xlane.f32.xlu2 %v1424_v6  ;;  %v1472_v6 = vperm.slane %v2817_v27, 5  ;;  %v1476_v56 = vperm.slane %v2817_v27, 6 }
 0x9ff   : >> { %v1416_v37 = vmul.f32 %v1411_v55, %v3123_v49 }
 0xa01   : >> { %v3400_v7 = vsub.f32 %v3382_v62, %v1416_v37 }
 0xa03   : >> { %v1422_v8 = vmul.f32 %v3400_v7, %v3400_v7 }
 0xa05   : >> { %v1427_v9 = vsel %vm529_vm0, %v1422_v8, 0.0 }
 0xa06   : >> { %1428 = vadd.xlane.f32.xlu0 %v1427_v9 }
 0xa0f   : >> { %2019 = vrot.lane.b32.xlu1 %v3348_v11, %s2926_s28 }
 0xa1a   : >> { %2021 = vrot.lane.b32.xlu0 %v3335_v63, %s2926_s28 }
 0xa22   : >> { %2015 = vrot.lane.b32.xlu0 %v3354_v12, %s2926_s28  ;;  %v3450_v12 = vperm.slane %v2817_v27, 7 }
 0xa69   : >> { %v1414_v60 = vpop.xlane.xlu1 %1413 }
 0xa6a   : >> { %v1417_v15 = vmul.f32 %v1414_v60, %v3123_v49 }
 0xa6c   : >> { %v3421_v19 = vsub.f32 %v3387_v29, %v1417_v15 }
 0xa6e   : >> { %v1423_v22 = vmul.f32 %v3421_v19, %v3421_v19 }
 0xa70   : >> { %v1430_v25 = vsel %vm609_vm1, %v1423_v22, 0.0  ;;  %v2818_v22 = vld [vmem:[%s3179_s16 + $0x8] sm:$0xff] }
 0xa71   : >> { %1431 = vadd.xlane.f32.xlu2 %v1430_v25  ;;  %v1426_v36 = vpop.xlane.xlu2 %1425  ;;  %v3453_v23 = vperm.slane %v2818_v22, 7 }
 0xa72   : >> { %v1433_v42 = vmul.f32 %v1426_v36, %v3123_v49 }
 0xa74   : >> { %v1436_v45 = vadd.f32 1e-06, %v1433_v42 }
 0xa76   : >> { %2799 = vrsqrt.f32 %v1436_v45  ;;  %vm1445_vm7 = vweird.f32 %v1436_v45 }
 0xa79   : >> { %v1429_v46 = vpop.xlane.xlu0 %1428 }
 0xa7a   : >> { %v1434_v48 = vmul.f32 %v1429_v46, %v3123_v49 }
 0xa7c   : >> { %v2800_v50 = vpop.eup %2799  ;;  %v1437_v51 = vadd.f32 1e-06, %v1434_v48 }
 0xa7d   : >> { %v1440_v57 = vmul.f32 %v2800_v50, %v1436_v45  ;;  %vm1446_vm6 = vweird.f32 %v2800_v50 }
 0xa7e   : >> { %2801 = vrsqrt.f32 %v1437_v51  ;;  %vm1447_vm8 = vmor %vm1445_vm7, %vm1446_vm6  ;;  %vm1455_vm10 = vweird.f32 %v1437_v51 }
 0xa7f   : >> { %v1441_v58 = vmul.f32 %v2800_v50, %v1440_v57 }
 0xa81   : >> { %v1442_v54 = vmul.f32 0.5, %v1441_v58 }
 0xa83   : >> { %v1443_v61 = vsub.f32 1.5, %v1442_v54 }
 0xa84   : >> { %v2802_v0 = vpop.eup %2801 }
 0xa85   : >> { %v1444_v41 = vmul.f32 %v2800_v50, %v1443_v61  ;;  %v1450_v1 = vmul.f32 %v2802_v0, %v1437_v51  ;;  %vm1456_vm9 = vweird.f32 %v2802_v0 }
 0xa86   : >> { %vm1457_vm11 = vmor %vm1455_vm10, %vm1456_vm9 }
 0xa87   : >> { %v1451_v2 = vmul.f32 %v2802_v0, %v1450_v1  ;;  %v1448_v52 = vsel %vm1447_vm8, %v2800_v50, %v1444_v41  ;;  %v2629_v41 = vld [vmem:[%s3484_s17 + $0x78] sm:$0xff] }
 0xa88   : >> { %v1469_v38 = vmul.f32 %v1448_v52, %v3393_v5  ;;  %1994 = vmatpush.bf16.msra.mxu3 %v2629_v41 }
 0xa89   : >> { %v1452_v3 = vmul.f32 0.5, %v1451_v2  ;;  %2017 = vrot.lane.b32.xlu2 %v3351_v32, %s2926_s28 }
 0xa8a   : >> { %v1473_v9 = vmul.f32 %v1472_v6, %v1469_v38 }
 0xa8b   : >> { %v1453_v4 = vsub.f32 1.5, %v1452_v3 }
 0xa8c   : >> { %v1477_v59 = vadd.f32 %v1476_v56, %v1473_v9 }
 0xa8d   : >> { %v1454_v55 = vmul.f32 %v2802_v0, %v1453_v4 }
 0xa8f   : >> { %v1458_v37 = vsel %vm1457_vm11, %v2802_v0, %v1454_v55  ;;  %v2621_v0 = vld [vmem:[%s3484_s17 + $0x38] sm:$0xff]  ;;  %v2628_v55 = vld [vmem:[%s3484_s17 + $0x70] sm:$0xff] }
 0xa90   : >> { %v1470_v8 = vmul.f32 %v1458_v37, %v3400_v7  ;;  %1976 = vmatpush.bf16.msra.mxu2 %v2621_v0  ;;  %1995 = vmatpush.bf16.msra.mxu3 %v2628_v55 }
 0xa92   : >> { %v1474_v10 = vmul.f32 %v1472_v6, %v1470_v8 }
 0xa94   : >> { %v1478_v34 = vadd.f32 %v1476_v56, %v1474_v10 }
 0xa96   : >> { %v1480_v13 = vpack.c.bf16 %v1478_v34, %v1477_v59 }
 0xa98   : >> { %2470 = vmatmul.msk.bf16.vlgmr.msrb.gmra.mxu0 %vm529_vm0, %v1480_v13  ;;  %2472 = vmatmul.msk.bf16.vlgmr.msrb.gmra.mxu1 %vm529_vm0, %v1480_v13 }
 0xae4   : >> { %v1432_v5 = vpop.xlane.xlu2 %1431 }
 0xae5   : >> { %v1435_v7 = vmul.f32 %v1432_v5, %v3123_v49 }
 0xae7   : >> { %v1438_v60 = vadd.f32 1e-06, %v1435_v7 }
 0xae9   : >> { %2803 = vrsqrt.f32 %v1438_v60  ;;  %vm1465_vm13 = vweird.f32 %v1438_v60 }
 0xaef   : >> { %v2804_v14 = vpop.eup %2803 }
 0xaf0   : >> { %v1460_v15 = vmul.f32 %v2804_v14, %v1438_v60  ;;  %vm1466_vm12 = vweird.f32 %v2804_v14 }
 0xaf1   : >> { %vm1467_vm14 = vmor %vm1465_vm13, %vm1466_vm12 }
 0xaf2   : >> { %v1461_v16 = vmul.f32 %v2804_v14, %v1460_v15 }
 0xaf4   : >> { %v1462_v17 = vmul.f32 0.5, %v1461_v16 }
 0xaf6   : >> { %v1463_v18 = vsub.f32 1.5, %v1462_v17  ;;  %v2619_v17 = vld [vmem:[%s3484_s17 + $0x28] sm:$0xff] }
 0xaf8   : >> { %v1464_v20 = vmul.f32 %v2804_v14, %v1463_v18  ;;  %v2627_v18 = vld [vmem:[%s3484_s17 + $0x68] sm:$0xff] }
 0xaf9   : >> { %1996 = vmatpush.bf16.msra.mxu3 %v2627_v18 }
 0xafa   : >> { %v1468_v63 = vsel %vm1467_vm14, %v2804_v14, %v1464_v20 }
 0xafb   : >> { %v1471_v11 = vmul.f32 %v1468_v63, %v3421_v19 }
 0xafd   : >> { %v1475_v32 = vmul.f32 %v1472_v6, %v1471_v11  ;;  %v2620_v6 = vld [vmem:[%s3484_s17 + $0x30] sm:$0xff] }
 0xafe   : >> { %1977 = vmatpush.bf16.msra.mxu2 %v2620_v6  ;;  %v2624_v6 = vld [vmem:[%s3484_s17 + $0x50] sm:$0xff] }
 0xaff   : >> { %v1479_v21 = vadd.f32 %v1476_v56, %v1475_v32 }
 0xb01   : >> { %v1481_v35 = vpack.c.bf16 %v1479_v21, %v1479_v21 }
 0xb02   : >> { %1978 = vmatpush.bf16.msra.mxu2 %v2619_v17 }
 0xb03   : >> { %2471 = vmatmul.msk.bf16.gmra.mxu0 %vm529_vm0, %v1481_v35  ;;  %2473 = vmatmul.msk.bf16.gmra.mxu1 %vm529_vm0, %v1481_v35 }
 0xb15   : >> { %v1549_v26 = vpop.f32.mrf.mxu0  ;;  %v1567_v24 = vpop.f32.mrf.mxu1 }
 0xb16   : >> { %v3456_v25 = vadd.f32 %v1549_v26, %v3450_v12  ;;  %v3459_v19 = vadd.f32 %v1567_v24, %v3453_v23 }
 0xb18   : >> { %v3462_v28 = vmul.f32 0.70710677, %v3456_v25  ;;  %v3465_v30 = vmul.f32 0.70710677, %v3459_v19 }
 0xb1a   : >> { %v1588_v31 = vmul.f32 %v3462_v28, %v3462_v28  ;;  %v1628_v36 = vmul.f32 %v3465_v30, %v3465_v30 }
 0xb1c   : >> { %v3472_v39 = vmin.f32 %v1588_v31, 16.0  ;;  %v3474_v33 = vmin.f32 %v1628_v36, 16.0 }
 0xb1d   : >> { %v1551_v47 = vpop.f32.mrf.mxu0  ;;  %v1569_v40 = vpop.f32.mrf.mxu1 }
 0xb1e   : >> { %v1590_v42 = vmul.f32 2.1237322e-06, %v3472_v39  ;;  %v1601_v43 = vmul.f32 3.8918573e-05, %v3472_v39  ;;  %v3479_v44 = vadd.f32 %v1551_v47, %v3450_v12  ;;  %v1641_v45 = vmul.f32 3.8918573e-05, %v3474_v33 }
 0xb1f   : >> { %v3488_v46 = vadd.f32 %v1569_v40, %v3453_v23  ;;  %v1630_v54 = vmul.f32 2.1237322e-06, %v3474_v33  ;;  %v2618_v47 = vld [vmem:[%s3484_s17 + $0x20] sm:$0xff] }
 0xb20   : >> { %v1591_v48 = vadd.f32 0.00028619796, %v1590_v42  ;;  %v1602_v50 = vadd.f32 0.001143296, %v1601_v43  ;;  %v1642_v51 = vadd.f32 0.001143296, %v1641_v45  ;;  %1979 = vmatpush.bf16.msra.mxu2 %v2618_v47 }
 0xb21   : >> { %v3491_v57 = vmul.f32 0.70710677, %v3479_v44  ;;  %v3496_v61 = vmul.f32 0.70710677, %v3488_v46  ;;  %v1631_v8 = vadd.f32 0.00028619796, %v1630_v54 }
 0xb22   : >> { %v1603_v58 = vmul.f32 %v1602_v50, %v3472_v39  ;;  %v1643_v1 = vmul.f32 %v1642_v51, %v3474_v33  ;;  %v1592_v52 = vmul.f32 %v1591_v48, %v3472_v39  ;;  %v2626_v40 = vld [vmem:[%s3484_s17 + $0x60] sm:$0xff] }
 0xb23   : >> { %v1668_v2 = vmul.f32 %v3491_v57, %v3491_v57  ;;  %v1708_v4 = vmul.f32 %v3496_v61, %v3496_v61  ;;  %v1632_v15 = vmul.f32 %v1631_v8, %v3474_v33  ;;  %1997 = vmatpush.bf16.msra.mxu3 %v2626_v40 }
 0xb24   : >> { %v1604_v3 = vadd.f32 0.014752088, %v1603_v58  ;;  %v1644_v38 = vadd.f32 0.014752088, %v1643_v1  ;;  %v1593_v34 = vadd.f32 0.0036580483, %v1592_v52 }
 0xb25   : >> { %v3506_v27 = vmin.f32 %v1668_v2, 16.0  ;;  %v3511_v9 = vmin.f32 %v1708_v4, 16.0  ;;  %v1633_v31 = vadd.f32 0.0036580483, %v1632_v15  ;;  %v2617_v58 = vld [vmem:[%s3484_s17 + $0x18] sm:$0xff] }
 0xb26   : >> { %v1605_v37 = vmul.f32 %v1604_v3, %v3472_v39  ;;  %v1645_v56 = vmul.f32 %v1644_v38, %v3474_v33  ;;  %v1594_v21 = vmul.f32 %v1593_v34, %v3472_v39  ;;  %v2625_v1 = vld [vmem:[%s3484_s17 + $0x58] sm:$0xff]  ;;  %1980 = vmatpush.bf16.msra.mxu2 %v2617_v58  ;;  %v2616_v38 = vld [vmem:[%s3484_s17 + $0x10] sm:$0xff] }
 0xb27   : >> { %v1670_v10 = vmul.f32 2.1237322e-06, %v3506_v27  ;;  %v1681_v59 = vmul.f32 3.8918573e-05, %v3506_v27  ;;  %v1710_v16 = vmul.f32 2.1237322e-06, %v3511_v9  ;;  %v1634_v52 = vmul.f32 %v1633_v31, %v3474_v33  ;;  %1998 = vmatpush.bf16.msra.mxu3 %v2625_v1 }
 0xb28   : >> { %v1606_v13 = vadd.f32 0.112945676, %v1605_v37  ;;  %v1646_v5 = vadd.f32 0.112945676, %v1645_v56  ;;  %v1721_v32 = vmul.f32 3.8918573e-05, %v3511_v9 }
 0xb29   : >> { %v1671_v7 = vadd.f32 0.00028619796, %v1670_v10  ;;  %v1682_v60 = vadd.f32 0.001143296, %v1681_v59  ;;  %v1711_v45 = vadd.f32 0.00028619796, %v1710_v16 }
 0xb2a   : >> { %v1607_v14 = vmul.f32 %v1606_v13, %v3472_v39  ;;  %v1647_v20 = vmul.f32 %v1646_v5, %v3474_v33  ;;  %v1722_v48 = vadd.f32 0.001143296, %v1721_v32  ;;  %v1595_v50 = vadd.f32 0.05243302, %v1594_v21  ;;  %1981 = vmatpush.bf16.msra.mxu2 %v2616_v38 }
 0xb2b   : >> { %v1672_v63 = vmul.f32 %v1671_v7, %v3506_v27  ;;  %v1683_v11 = vmul.f32 %v1682_v60, %v3506_v27  ;;  %v1712_v3 = vmul.f32 %v1711_v45, %v3511_v9  ;;  %v1635_v56 = vadd.f32 0.05243302, %v1634_v52  ;;  %1999 = vmatpush.bf16.msra.mxu3 %v2624_v6  ;;  %v2615_v7 = vld [vmem:[%s3484_s17 + $0x8] sm:$0xff] }
 0xb2c   : >> { %v1608_v35 = vadd.f32 0.4994258, %v1607_v14  ;;  %v1648_v22 = vadd.f32 0.4994258, %v1647_v20  ;;  %v1723_v41 = vmul.f32 %v1722_v48, %v3511_v9  ;;  %v1596_v4 = vmul.f32 %v1595_v50, %v3472_v39  ;;  %v2623_v60 = vld [vmem:[%s3484_s17 + $0x48] sm:$0xff] }
 0xb2d   : >> { %v1684_v26 = vadd.f32 0.014752088, %v1683_v11  ;;  %v1673_v36 = vadd.f32 0.0036580483, %v1672_v63  ;;  %v1713_v59 = vadd.f32 0.0036580483, %v1712_v3  ;;  %v1636_v11 = vmul.f32 %v1635_v56, %v3474_v33 }
 0xb2e   : >> { %v1609_v24 = vmul.f32 %v1608_v35, %v3472_v39  ;;  %v1649_v42 = vmul.f32 %v1648_v22, %v3474_v33  ;;  %v1724_v37 = vadd.f32 0.014752088, %v1723_v41  ;;  %v1597_v5 = vadd.f32 0.18741608, %v1596_v4  ;;  %1982 = vmatpush.bf16.msra.mxu2 %v2615_v7 }
 0xb2f   : >> { %v1685_v43 = vmul.f32 %v1684_v26, %v3506_v27  ;;  %v1674_v2 = vmul.f32 %v1673_v36, %v3506_v27  ;;  %v1714_v21 = vmul.f32 %v1713_v59, %v3511_v9  ;;  %2000 = vmatpush.bf16.msra.mxu3 %v2623_v60  ;;  %v2614_v26 = vld [vmem:[%s3484_s17] sm:$0xff]  ;;  %v1637_v45 = vadd.f32 0.18741608, %v1636_v11 }
 0xb30   : >> { %v3531_v51 = vadd.f32 1.0, %v1609_v24  ;;  %v3534_v54 = vadd.f32 1.0, %v1649_v42  ;;  %v1725_v34 = vmul.f32 %v1724_v37, %v3511_v9  ;;  %v1598_v35 = vmul.f32 %v1597_v5, %v3472_v39  ;;  %v2622_v24 = vld [vmem:[%s3484_s17 + $0x40] sm:$0xff] }
 0xb31   : >> { %v1686_v0 = vadd.f32 0.112945676, %v1685_v43  ;;  %v1675_v8 = vadd.f32 0.05243302, %v1674_v2  ;;  %v1715_v48 = vadd.f32 0.05243302, %v1714_v21 }
 0xb32   : >> { %2805 = vrcp.f32 %v3531_v51  ;;  %v1726_v20 = vadd.f32 0.112945676, %v1725_v34  ;;  %v1622_v43 = vand.u32 2147483648, %v3531_v51  ;;  %v1599_v50 = vadd.f32 1.1283791, %v1598_v35  ;;  %1983 = vmatpush.bf16.msra.mxu2 %v2614_v26 }
 0xb33   : >> { %2807 = vrcp.f32 %v3534_v54  ;;  %v1687_v55 = vmul.f32 %v1686_v0, %v3506_v27  ;;  %v1676_v18 = vmul.f32 %v1675_v8, %v3506_v27  ;;  %vm1616_vm2 = vweird.f32 %v3531_v51  ;;  %2001 = vmatpush.bf16.msra.mxu3 %v2622_v24 }
 0xb34   : >> { %v1727_v22 = vmul.f32 %v1726_v20, %v3511_v9  ;;  %v1620_v39 = vand.u32 2147483647, %v3531_v51  ;;  %v1623_v3 = vor.u32 1.1754944e-38, %v1622_v43  ;;  %v1716_v4 = vmul.f32 %v1715_v48, %v3511_v9 }
 0xb35   : >> { %v1688_v10 = vadd.f32 0.4994258, %v1687_v55  ;;  %v1677_v47 = vadd.f32 0.18741608, %v1676_v18  ;;  %v1600_v38 = vmul.f32 %v1599_v50, %v3462_v28  ;;  %v1662_v8 = vand.u32 2147483648, %v3534_v54 }
 0xb36   : >> { %v1728_v40 = vadd.f32 0.4994258, %v1727_v22  ;;  %vm1621_vm6 = vcmp.eq.f32.partialorder %v1620_v39, 8.507059e+37  ;;  %vm1656_vm8 = vweird.f32 %v3534_v54  ;;  %v1717_v34 = vadd.f32 0.18741608, %v1716_v4 }
 0xb37   : >> { %v1689_v16 = vmul.f32 %v1688_v10, %v3506_v27  ;;  %v1678_v1 = vmul.f32 %v1677_v47, %v3506_v27  ;;  %v1660_v27 = vand.u32 2147483647, %v3534_v54  ;;  %v1578_v43 = vmul.f32 0.5, %v3479_v44 }
 0xb38   : >> { %v2806_v13 = vpop.eup %2805  ;;  %v1729_v58 = vmul.f32 %v1728_v40, %v3511_v9  ;;  %v1718_v20 = vmul.f32 %v1717_v34, %v3511_v9  ;;  %v1576_v9 = vmul.f32 0.5, %v3456_v25  ;;  %v1577_v44 = vmul.f32 0.5, %v3459_v19 }
 0xb39   : >> { %v3550_v14 = vpop.eup %2807  ;;  %v1612_v15 = vmul.f32 %v2806_v13, %v3531_v51  ;;  %v1690_v32 = vadd.f32 1.0, %v1689_v16  ;;  %vm1617_vm15 = vweird.f32 %v2806_v13  ;;  %v1638_v51 = vmul.f32 %v1637_v45, %v3474_v33 }
 0xb3a   : >> { %v1652_v17 = vmul.f32 %v3550_v14, %v3534_v54  ;;  %vm1618_vm3 = vmor %vm1616_vm2, %vm1617_vm15  ;;  %v3569_v2 = vadd.f32 1.0, %v1729_v58  ;;  %vm1657_vm7 = vweird.f32 %v3550_v14  ;;  %v1679_v56 = vadd.f32 1.1283791, %v1678_v1 }
 0xb3b   : >> { %v1613_v63 = vsub.f32 1.0, %v1612_v15  ;;  %2809 = vrcp.f32 %v1690_v32  ;;  %v1700_v28 = vand.u32 2147483647, %v1690_v32  ;;  %v1702_v59 = vand.u32 2147483648, %v1690_v32  ;;  %vm3580_vm9 = vmor %vm1656_vm8, %vm1657_vm7 }
 0xb3c   : >> { %v1653_v36 = vsub.f32 1.0, %v1652_v17  ;;  %2811 = vrcp.f32 %v3569_v2  ;;  %v1639_v7 = vadd.f32 1.1283791, %v1638_v51  ;;  %vm1661_vm11 = vcmp.eq.f32.partialorder %v1660_v27, 8.507059e+37 }
 0xb3d   : >> { %v1614_v31 = vmul.f32 %v2806_v13, %v1613_v63  ;;  %v1663_v15 = vor.u32 1.1754944e-38, %v1662_v8  ;;  %vm1696_vm12 = vweird.f32 %v1690_v32  ;;  %v1680_v17 = vmul.f32 %v1679_v56, %v3491_v57 }
 0xb3e   : >> { %v1654_v0 = vmul.f32 %v3550_v14, %v1653_v36  ;;  %vm1701_vm14 = vcmp.eq.f32.partialorder %v1700_v28, 8.507059e+37  ;;  %v1703_v18 = vor.u32 1.1754944e-38, %v1702_v59  ;;  %v1640_v22 = vmul.f32 %v1639_v7, %v3465_v30 }
 0xb3f   : >> { %v1615_v42 = vadd.f32 %v2806_v13, %v1614_v31  ;;  %v1740_v36 = vand.u32 2147483647, %v3569_v2  ;;  %v1742_v57 = vand.u32 2147483648, %v3569_v2  ;;  %vm1736_vm2 = vweird.f32 %v3569_v2 }
 0xb40   : >> { %v1655_v37 = vadd.f32 %v3550_v14, %v1654_v0 }
 0xb41   : >> { %v1619_v41 = vsel %vm1618_vm3, %v2806_v13, %v1615_v42  ;;  %v2810_v52 = vpop.eup %2809  ;;  %v1743_v39 = vor.u32 1.1754944e-38, %v1742_v57 }
 0xb42   : >> { %v1692_v6 = vmul.f32 %v2810_v52, %v1690_v32  ;;  %v1624_v55 = vsel %vm1621_vm6, %v1623_v3, %v1619_v41  ;;  %vm1697_vm10 = vweird.f32 %v2810_v52  ;;  %v1659_v60 = vsel %vm3580_vm9, %v3550_v14, %v1655_v37  ;;  %v2812_v54 = vpop.eup %2811 }
 0xb43   : >> { %v1625_v33 = vmul.f32 %v1624_v55, %v1600_v38  ;;  %vm1698_vm13 = vmor %vm1696_vm12, %vm1697_vm10  ;;  %v1664_v11 = vsel %vm1661_vm11, %v1663_v15, %v1659_v60  ;;  %v1732_v35 = vmul.f32 %v2812_v54, %v3569_v2  ;;  %v1719_v32 = vadd.f32 1.1283791, %v1718_v20 }
 0xb44   : >> { %v1693_v10 = vsub.f32 1.0, %v1692_v6  ;;  %v1665_v31 = vmul.f32 %v1664_v11, %v1640_v22  ;;  %vm1737_vm15 = vweird.f32 %v2812_v54  ;;  %vm1741_vm6 = vcmp.eq.f32.partialorder %v1740_v36, 8.507059e+37 }
 0xb45   : >> { %v2474_v63 = vclamps-f32 %v1625_v33, 1.0  ;;  %v1733_v24 = vsub.f32 1.0, %v1732_v35  ;;  %v1720_v50 = vmul.f32 %v1719_v32, %v3496_v61  ;;  %vm1738_vm3 = vmor %vm1736_vm2, %vm1737_vm15  ;;  %v1579_v38 = vmul.f32 0.5, %v3488_v46 }
 0xb46   : >> { %v1694_v5 = vmul.f32 %v2810_v52, %v1693_v10  ;;  %v2475_v30 = vclamps-f32 %v1665_v31, 1.0  ;;  %vm2177_vm15 = vcmask (%p574_p11), 73728  }
 0xb47   : >> { %v1828_v47 = vadd.f32 1.0, %v2474_v63  ;;  %v1734_v42 = vmul.f32 %v2812_v54, %v1733_v24 }
 0xb48   : >> { %v1695_v16 = vadd.f32 %v2810_v52, %v1694_v5  ;;  %v1829_v4 = vadd.f32 1.0, %v2475_v30 }
 0xb49   : >> { %v1735_v48 = vadd.f32 %v2812_v54, %v1734_v42  ;;  %v1834_v58 = vmul.f32 %v1828_v47, %v1576_v9 }
 0xb4a   : >> { %v1699_v21 = vsel %vm1698_vm13, %v2810_v52, %v1695_v16  ;;  %v1835_v51 = vmul.f32 %v1829_v4, %v1577_v44 }
 0xb4b   : >> { %v1704_v14 = vsel %vm1701_vm14, %v1703_v18, %v1699_v21  ;;  %v1739_v41 = vsel %vm1738_vm3, %v2812_v54, %v1735_v48 }
 0xb4c   : >> { %v1705_v26 = vmul.f32 %v1704_v14, %v1680_v17  ;;  %v1744_v1 = vsel %vm1741_vm6, %v1743_v39, %v1739_v41 }
 0xb4d   : >> { %v1745_v3 = vmul.f32 %v1744_v1, %v1720_v50 }
 0xb4e   : >> { %v2476_v40 = vclamps-f32 %v1705_v26, 1.0 }
 0xb4f   : >> { %v2477_v25 = vclamps-f32 %v1745_v3, 1.0 }
 0xb50   : >> { %v1830_v45 = vadd.f32 1.0, %v2476_v40 }
 0xb51   : >> { %v1831_v2 = vadd.f32 1.0, %v2477_v25 }
 0xb52   : >> { %v1836_v0 = vmul.f32 %v1830_v45, %v1578_v43  ;;  %v2022_v45 = vpop.permute.xlu0 %2021 }
 0xb53   : >> { %v1837_v6 = vmul.f32 %v1831_v2, %v1579_v38  ;;  %2037 = vmatpush.bf16.msra.mxu0 %v2022_v45 }
 0xb54   : >> { %v1840_v52 = vpack.c.bf16 %v1836_v0, %v1834_v58 }
 0xb55   : >> { %v1841_v61 = vpack.c.bf16 %v1837_v6, %v1835_v51 }
 0xb56   : >> { %1984 = vmatmul.bf16.vlgmr.msra.gmra.mxu2 %v1840_v52 }
 0xb57   : >> { %2002 = vmatmul.bf16.vlgmr.msra.gmra.mxu3 %v1841_v61 }
 0xb80   : >> { %v1554_v55 = vpop.f32.mrf.mxu0  ;;  %v1572_v37 = vpop.f32.mrf.mxu1 }
 0xb81   : >> { %v3600_v27 = vadd.f32 %v1554_v55, %v3450_v12  ;;  %v3603_v8 = vadd.f32 %v1572_v37, %v3453_v23 }
 0xb83   : >> { %v3606_v56 = vmul.f32 0.70710677, %v3600_v27  ;;  %v3609_v19 = vmul.f32 0.70710677, %v3603_v8 }
 0xb85   : >> { %v1748_v46 = vmul.f32 %v3606_v56, %v3606_v56  ;;  %v1788_v10 = vmul.f32 %v3609_v19, %v3609_v19 }
 0xb87   : >> { %v1749_v28 = vmin.f32 %v1748_v46, 16.0  ;;  %v1789_v59 = vmin.f32 %v1788_v10, 16.0 }
 0xb88   : >> { %v1556_v34 = vpop.f32.mrf.mxu0  ;;  %v1574_v12 = vpop.f32.mrf.mxu1 }
 0xb89   : >> { %v1750_v33 = vmul.f32 2.1237322e-06, %v1749_v28  ;;  %v1790_v13 = vmul.f32 2.1237322e-06, %v1789_v59  ;;  %v1761_v23 = vmul.f32 3.8918573e-05, %v1749_v28 }
 0xb8a   : >> { %v1801_v5 = vmul.f32 3.8918573e-05, %v1789_v59 }
 0xb8b   : >> { %v1751_v7 = vadd.f32 0.00028619796, %v1750_v33  ;;  %v1791_v60 = vadd.f32 0.00028619796, %v1790_v13  ;;  %v1762_v15 = vadd.f32 0.001143296, %v1761_v23 }
 0xb8c   : >> { %v1802_v16 = vadd.f32 0.001143296, %v1801_v5 }
 0xb8d   : >> { %v1752_v54 = vmul.f32 %v1751_v7, %v1749_v28  ;;  %v1792_v17 = vmul.f32 %v1791_v60, %v1789_v59  ;;  %v1763_v18 = vmul.f32 %v1762_v15, %v1749_v28 }
 0xb8e   : >> { %v1803_v20 = vmul.f32 %v1802_v16, %v1789_v59 }
 0xb8f   : >> { %v1753_v63 = vadd.f32 0.0036580483, %v1752_v54  ;;  %v1764_v11 = vadd.f32 0.014752088, %v1763_v18  ;;  %v1793_v35 = vadd.f32 0.0036580483, %v1792_v17 }
 0xb90   : >> { %v1804_v21 = vadd.f32 0.014752088, %v1803_v20  ;;  %v1580_v20 = vmul.f32 0.5, %v3600_v27 }
 0xb91   : >> { %v1765_v22 = vmul.f32 %v1764_v11, %v1749_v28  ;;  %v1754_v26 = vmul.f32 %v1753_v63, %v1749_v28  ;;  %v1794_v32 = vmul.f32 %v1793_v35, %v1789_v59 }
 0xb92   : >> { %v1805_v14 = vmul.f32 %v1804_v21, %v1789_v59 }
 0xb93   : >> { %v1766_v24 = vadd.f32 0.112945676, %v1765_v22  ;;  %v1755_v47 = vadd.f32 0.05243302, %v1754_v26  ;;  %v1795_v9 = vadd.f32 0.05243302, %v1794_v32  ;;  %v2018_v26 = vpop.permute.xlu2 %2017 }
 0xb94   : >> { %v1806_v31 = vadd.f32 0.112945676, %v1805_v14  ;;  %v586_v32 = vld [vmem:[%s3179_s16 + $0x10] sm:$0xff] }
 0xb95   : >> { %v1767_v36 = vmul.f32 %v1766_v24, %v1749_v28  ;;  %v1756_v30 = vmul.f32 %v1755_v47, %v1749_v28  ;;  %v1796_v58 = vmul.f32 %v1795_v9, %v1789_v59  ;;  %v2016_v24 = vpop.permute.xlu0 %2015 }
 0xb96   : >> { %v1807_v57 = vmul.f32 %v1806_v31, %v1789_v59 }
 0xb97   : >> { %v1768_v40 = vadd.f32 0.4994258, %v1767_v36  ;;  %v1757_v0 = vadd.f32 0.18741608, %v1756_v30  ;;  %v1797_v41 = vadd.f32 0.18741608, %v1796_v58 }
 0xb98   : >> { %v1808_v42 = vadd.f32 0.4994258, %v1807_v57  ;;  %v1879_v36 = vperm.slane %v586_v32, 0 }
 0xb99   : >> { %v1769_v43 = vmul.f32 %v1768_v40, %v1749_v28  ;;  %v1758_v52 = vmul.f32 %v1757_v0, %v1749_v28  ;;  %v1798_v25 = vmul.f32 %v1797_v41, %v1789_v59  ;;  %v602_v41 = vld [vmem:[%s3367_s23 + $0x4] sm:$0xf]  ;;  %s2188_s23 = scalar_lea.hbm (%p574_p11), %s3705_s12, %s3013_s25 }
 0xb9a   : >> { %v1809_v48 = vmul.f32 %v1808_v42, %v1789_v59  ;;  %s2192_s20 = sshll.u32 (%p574_p11), %s2188_s23, 4  ;;  %s2193_s20 = int_to_ptr.hbm [resolvable:$true] %s2192_s20 }
 0xb9b   : >> { %v1770_v50 = vadd.f32 1.0, %v1769_v43  ;;  %v1759_v2 = vadd.f32 1.1283791, %v1758_v52  ;;  %v1799_v46 = vadd.f32 1.1283791, %v1798_v25  ;;  %s2835_s28 = sshra.s32 (%p574_p11), %s2193_s20, 4  ;;  %s2836_s28 = int_to_ptr.hbm [resolvable:$true] %s2835_s28 }
 0xb9c   : >> { %v1810_v39 = vadd.f32 1.0, %v1809_v48  ;;  %s2837_s19 = scalar_lea.hbm (%p574_p11), %s2836_s28, 1  ;;  %p2842_p1 = scmp.lt.s32.totalorder (%p574_p11), %s2836_s28, %s3705_s12 }
 0xb9d   : >> { %2813 = vrcp.f32 %v1770_v50  ;;  %v1782_v51 = vand.u32 2147483648, %v1770_v50  ;;  %v1780_v55 = vand.u32 2147483647, %v1770_v50  ;;  %vm1776_vm9 = vweird.f32 %v1770_v50  ;;  %p2838_p12 = scmp.ne.s32.totalorder (%p574_p11), %s2836_s28, %s2837_s19  ;;  %p2843_p2 = scmp.lt.s32.totalorder (%p574_p11), %s2841_s26, %s2837_s19 }
 0xb9e   : >> { %2815 = vrcp.f32 %v1810_v39  ;;  %v1822_v37 = vand.u32 2147483648, %v1810_v39  ;;  %v1820_v34 = vand.u32 2147483647, %v1810_v39  ;;  %vm1816_vm11 = vweird.f32 %v1810_v39 }
 0xb9f   : >> { %v1783_v28 = vor.u32 1.1754944e-38, %v1782_v51  ;;  %v1760_v59 = vmul.f32 %v1759_v2, %v3606_v56  ;;  %vm1781_vm12 = vcmp.eq.f32.partialorder %v1780_v55, 8.507059e+37  ;;  %v1800_v5 = vmul.f32 %v1799_v46, %v3609_v19  ;;  %v2020_v19 = vpop.permute.xlu1 %2019  ;;  %p2839_p13 = pnand (%p574_p11), %p2838_p12, %p3030_p5  ;;  %p2844_p3 = por (%p574_p11), %p2843_p2, %p2842_p1 }
 0xba0   : >> { %v1823_v23 = vor.u32 1.1754944e-38, %v1822_v37  ;;  %vm1821_vm14 = vcmp.eq.f32.partialorder %v1820_v34, 8.507059e+37  ;;  %v1581_v56 = vmul.f32 0.5, %v3603_v8  ;;  %2038 = vmatpush.bf16.msra.mxu0 %v2020_v19 }
 0xba1   : > { %p2840_p0 = pneg (%p574_p11), %p2839_p13 }
 0xba3   : >> { %v2814_v1 = vpop.eup %2813  ;;  %p2845_p4 = pnand (%p574_p11), %p2844_p3, %p2840_p0 }
 0xba4   : >> { %v2816_v3 = vpop.eup %2815  ;;  %v1772_v4 = vmul.f32 %v2814_v1, %v1770_v50  ;;  %vm1777_vm7 = vweird.f32 %v2814_v1  ;;  %2039 = vmatpush.bf16.msra.mxu0 %v2018_v26 }
 0xba5   : >> { %v1812_v44 = vmul.f32 %v2816_v3, %v1810_v39  ;;  %vm1817_vm8 = vweird.f32 %v2816_v3  ;;  %vm1778_vm10 = vmor %vm1776_vm9, %vm1777_vm7 }
 0xba6   : >> { %v1773_v38 = vsub.f32 1.0, %v1772_v4  ;;  %vm1818_vm13 = vmor %vm1816_vm11, %vm1817_vm8 }
 0xba7   : >> { %v1813_v6 = vsub.f32 1.0, %v1812_v44 }
 0xba8   : >> { %v1774_v61 = vmul.f32 %v2814_v1, %v1773_v38  ;;  %2040 = vmatpush.bf16.msra.mxu0 %v2016_v24 }
 0xba9   : >> { %v1814_v10 = vmul.f32 %v2816_v3, %v1813_v6 }
 0xbaa   : >> { %v1775_v12 = vadd.f32 %v2814_v1, %v1774_v61 }
 0xbab   : >> { %v1815_v33 = vadd.f32 %v2816_v3, %v1814_v10  ;;  %v2056_v10 = vperm.slane %v586_v32, 2 }
 0xbac   : >> { %v1779_v13 = vsel %vm1778_vm10, %v2814_v1, %v1775_v12  ;;  %v2064_v1 = vsel %vm1378_vm4, %v602_v41, 0 }
 0xbad   : >> { %v1784_v7 = vsel %vm1781_vm12, %v1783_v28, %v1779_v13  ;;  %v1819_v60 = vsel %vm1818_vm13, %v2816_v3, %v1815_v33  ;;  %2073 = vmatpush.bf16.msra.mxu1 %v2064_v1  ;;  %v2014_v3 = vperm.slane %v586_v32, 1  ;;  %v2090_v32 = vld [vmem:[%s3697_s4] sm:$0xff] (%p574_p11) }
 0xbae   : >> { %v1785_v15 = vmul.f32 %v1784_v7, %v1760_v59  ;;  %v1824_v16 = vsel %vm1821_vm14, %v1823_v23, %v1819_v60 }
 0xbaf   : >> { %v1825_v54 = vmul.f32 %v1824_v16, %v1800_v5 }
 0xbb0   : >> { %v2478_v17 = vclamps-f32 %v1785_v15, 1.0 }
 0xbb1   : >> { %v2479_v18 = vclamps-f32 %v1825_v54, 1.0 }
 0xbb2   : >> { %v1832_v63 = vadd.f32 1.0, %v2478_v17 }
 0xbb3   : >> { %v1833_v11 = vadd.f32 1.0, %v2479_v18  ;;  %v2633_v18 = vld [vmem:[%s3696_s3 + $0x18] sm:$0xff] (%p574_p11) }
 0xbb4   : >> { %v1838_v21 = vmul.f32 %v1832_v63, %v1580_v20  ;;  %v2632_v20 = vld [vmem:[%s3696_s3 + $0x10] sm:$0xff] (%p574_p11)  ;;  %v2631_v63 = vld [vmem:[%s3696_s3 + $0x8] sm:$0xff] (%p574_p11) }
 0xbb5   : >> { %v1839_v35 = vmul.f32 %v1833_v11, %v1581_v56  ;;  %v2630_v56 = vld [vmem:[%s3696_s3] sm:$0xff] (%p574_p11) }
 0xbb6   : >> { %v1842_v22 = vpack.c.bf16 %v1838_v21, %v1838_v21 }
 0xbb7   : >> { %v1843_v14 = vpack.c.bf16 %v1839_v35, %v1839_v35 }
 0xbb8   : >> { %1989 = vmatmul.bf16.gmra.mxu2 %v1842_v22 }
 0xbb9   : >> { %2007 = vmatmul.bf16.gmra.mxu3 %v1843_v14 }
 0xbd9   : >> { %v1985_v31 = vpop.f32.mrf.mxu2 }
 0xbda   : >> { %v2003_v27 = vpop.f32.mrf.mxu3  ;;  %v1986_v8 = vadd.f32 %v1985_v31, %v1879_v36 }
 0xbdc   : >> { %v2004_v42 = vadd.f32 %v2003_v27, %v1986_v8 }
 0xbe1   : >> { %v1987_v57 = vpop.f32.mrf.mxu2 }
 0xbe2   : >> { %v1988_v47 = vadd.f32 %v1987_v57, %v1879_v36  ;;  %v2005_v40 = vpop.f32.mrf.mxu3 }
 0xbe4   : >> { %v2006_v9 = vadd.f32 %v2005_v40, %v1988_v47  ;;  %v2159_v40 = vrot.slane (%p574_p11), %v2090_v32, 2 }
 0xbe6   : >> { %v2012_v43 = vpack.c.bf16 %v2006_v9, %v2004_v42 }
 0xbe8   : >> { %2546 = vmatmul.msk.bf16.vlgmr.msra.gmra.mxu0 %vm529_vm0, %v2012_v43 }
 0xbe9   : > { %2168 = vmatpush.bf16.msra.mxu0 (%p574_p11), %v2633_v18 }
 0xbed   : > { %2169 = vmatpush.bf16.msra.mxu0 (%p574_p11), %v2632_v20 }
 0xbf1   : > { %2170 = vmatpush.bf16.msra.mxu0 (%p574_p11), %v2631_v63 }
 0xbf5   : > { %2171 = vmatpush.bf16.msra.mxu0 (%p574_p11), %v2630_v56 }
 0xc3b   : >> { %v1990_v45 = vpop.f32.mrf.mxu2 }
 0xc3c   : >> { %v1991_v48 = vadd.f32 %v1990_v45, %v1879_v36  ;;  %v2008_v30 = vpop.f32.mrf.mxu3  ;;  %v2123_v36 = vrot.slane (%p574_p11), %v2090_v32, 1 }
 0xc3e   : >> { %v2009_v50 = vadd.f32 %v2008_v30, %v1991_v48 }
 0xc40   : >> { %v2013_v39 = vpack.c.bf16 %v2009_v50, %v2009_v50 }
 0xc42   : >> { %2547 = vmatmul.msk.bf16.gmra.mxu0 %vm529_vm0, %v2013_v39 }
 0xc43   : >> { %v1992_v58 = vpop.f32.mrf.mxu2 }
 0xc44   : >> { %v2010_v0 = vpop.f32.mrf.mxu3 }
 0xc65   : >> { %v2042_v52 = vpop.f32.mrf.mxu0 }
 0xc66   : >> { %v2043_v4 = vadd.f32 %v2042_v52, %v2014_v3 }
 0xc68   : >> { %v2051_v38 = vmax.f32 %v2043_v4, 0.0 }
 0xc6d   : >> { %v2044_v25 = vpop.f32.mrf.mxu0 }
 0xc6e   : >> { %v2045_v44 = vadd.f32 %v2044_v25, %v2014_v3 }
 0xc70   : >> { %v2052_v2 = vmax.f32 %v2045_v44, 0.0 }
 0xc72   : >> { %v2054_v51 = vpack.c.bf16 %v2052_v2, %v2051_v38 }
 0xc74   : >> { %2548 = vmatmul.msk.bf16.vlgmr.msra.gmra.mxu1 %vm1371_vm5, %v2054_v51 }
 0xcbf   : >> { %v2047_v6 = vpop.f32.mrf.mxu0 }
 0xcc0   : >> { %v2048_v61 = vadd.f32 %v2047_v6, %v2014_v3 }
 0xcc2   : >> { %v2053_v55 = vmax.f32 %v2048_v61, 0.0 }
 0xcc4   : >> { %v2055_v37 = vpack.c.bf16 %v2053_v55, %v2053_v55 }
 0xcc6   : >> { %2549 = vmatmul.msk.bf16.gmra.mxu1 %vm1371_vm5, %v2055_v37 }
 0xcc7   : >> { %v2049_v46 = vpop.f32.mrf.mxu0 }
 0xcf1   : >> { %v2075_v34 = vpop.f32.mrf.mxu1 }
 0xcf2   : >> { %v2076_v12 = vadd.f32 %v2075_v34, %v2056_v10 }
 0xcf4   : >> { %v2084_v28 = vadd.f32 %v2076_v12, %v2004_v42 }
 0xcf6   : >> { %v2087_v33 = vadd.f32 %v2084_v28, %v3377_v53  }
 0xcf8   : > { %v2092_v53 = vsel (%p574_p11), %vm609_vm1, %v2087_v33, 0.0 }
 0xcf9   : >> { %v2077_v59 = vpop.f32.mrf.mxu1  ;;  %2093 = vadd.xlane.f32.xlu0 (%p574_p11), %v2092_v53 }
 0xcfa   : >> { %v2078_v13 = vadd.f32 %v2077_v59, %v2056_v10 }
 0xcfc   : >> { %v2085_v23 = vadd.f32 %v2078_v13, %v2006_v9 }
 0xcfe   : >> { %v2088_v38 = vadd.f32 %v2085_v23, %v3382_v62  }
 0xd43   : >> { %v2080_v5 = vpop.f32.mrf.mxu1 }
 0xd44   : >> { %v2081_v7 = vadd.f32 %v2080_v5, %v2056_v10 }
 0xd46   : >> { %v2086_v60 = vadd.f32 %v2081_v7, %v2009_v50 }
 0xd47   : > { %576 = sbr.rel (!%p574_p11) target bundleno = 194 (0xc2), region = 117 }
 0xd48   : >> { %v2089_v37 = vadd.f32 %v2086_v60, %v3387_v29   ;;  %v3719_v29 = vmov %v2087_v33 }
 0xd4b   : >> { %v2082_v15 = vpop.f32.mrf.mxu1 }
 0xd6c   : > { %v2094_v62 = vpop.xlane.xlu0 %2093 }
 0xd6d   : > { %v2102_v16 = vmul.f32 %v2094_v62, %v3123_v49 }
 0xd6f   : > { %v2103_v29 = vsub.f32 %v2087_v33, %v2102_v16 }
 0xd71   : > { %v2104_v54 = vmul.f32 %v2103_v29, %v2103_v29 }
 0xd73   : > { %v2105_v17 = vsel %vm609_vm1, %v2104_v54, 0.0 }
 0xd74   : > { %2106 = vadd.xlane.f32.xlu0 %v2105_v17 }
 0xde7   : > { %v2107_v11 = vpop.xlane.xlu0 %2106 }
 0xde8   : > { %v2108_v21 = vmul.f32 %v2107_v11, %v3123_v49 }
 0xdea   : > { %v2109_v35 = vadd.f32 1e-06, %v2108_v21 }
 0xdec   : > { %2819 = vrsqrt.f32 %v2109_v35  ;;  %vm2116_vm4 = vweird.f32 %v2109_v35 }
 0xdf2   : > { %v2820_v22 = vpop.eup %2819 }
 0xdf3   : > { %v2111_v14 = vmul.f32 %v2820_v22, %v2109_v35  ;;  %vm2117_vm1 = vweird.f32 %v2820_v22 }
 0xdf4   : > { %vm2118_vm5 = vmor %vm2116_vm4, %vm2117_vm1 }
 0xdf5   : > { %v2112_v19 = vmul.f32 %v2820_v22, %v2111_v14 }
 0xdf7   : > { %v2113_v26 = vmul.f32 0.5, %v2112_v19 }
 0xdf9   : > { %v2114_v24 = vsub.f32 1.5, %v2113_v26 }
 0xdfb   : > { %v2115_v31 = vmul.f32 %v2820_v22, %v2114_v24 }
 0xdfd   : > { %v2119_v27 = vsel %vm2118_vm5, %v2820_v22, %v2115_v31 }
 0xdfe   : > { %v2120_v49 = vmul.f32 %v2119_v27, %v2103_v29 }
 0xe00   : > { %v2121_v57 = vmul.f32 %v2120_v49, %v2090_v32 }
 0xe02   : > { %v2125_v8 = vadd.f32 %v2123_v36, %v2121_v57 }
 0xe04   : > { %v2126_v47 = vpack.c.bf16 %v2125_v8, %v2125_v8 }
 0xe06   : > { %2566 = vmatmul.msk.bf16.vlgmr.msra.gmra.mxu0 %vm529_vm0, %v2126_v47 }
 0xe83   : > { %v2173_v42 = vpop.f32.mrf.mxu0 }
 0xe84   : > { %v2174_v9 = vadd.f32 %v2173_v42, %v2159_v40 }
 0xe86   : > { %2178 = vst.msk [vmem:[%s3095_s18] sm:$0x1] %vm2177_vm15, %v2174_v9 }
 0xe87   : > { %2848 = shalt.err (!%p2845_p4)
}
 0xe88   : > { %2647 = dma.vmem_to_hbm [thread:$0]  (%p3030_p5), %s2191_s15, 16, %s2193_s20, %s2180_s30  }
 0xe8b   : > { %v2175_v43 = vpop.f32.mrf.mxu0 }
 0xe8c PF: > { %p2653_p7 = scmp.ge.s32.totalorder %s2899_s24, 2  ;;  %s2204_s18 = sand.u32 1, %s2887_s21  }
 0xe8d   : > { %s2205_s23 = scalar_lea.sflag [#allocation3], %s2204_s18 }
 0xe8e   : > { %p2650_p8 = pnand %p2653_p7, %p3034_p6 }
 0xe90   : > { %p2651_p9 = pneg %p2650_p8 }
 0xe92   : > { %2882 = dma.done.wait (%p2651_p9), %s2205_s23, 16  }
 0xe93   : > { %2884 = vsyncadd (%p2651_p9), %s2205_s23, 4294967280  ;;  %s3721_s24 = sld [smem:[#allocation6_spill]]  ;;  %s3724_s21 = smov %s2891_s22 }
 0xe94   : > { %s3722_s27 = sld [smem:[#allocation5_spill]] }
 0xe95   : > { %s3723_s23 = sld [smem:[#allocation7_spill]] }
 0xe99   : > { %p22_p10 = scmp.ge.s32.totalorder %s3721_s24, 4  }
 0xe9a   : > { %s3725_s22 = smov %s3722_s27 }
 0xe9b   :  { %24 = sbr.rel (!%p22_p10) target bundleno = 3 (0x3), region = 128 }
 0xea0   :  { %2210 = vsyncpa [#allocation3], 1 }
 0xea1   :  { %2212 = vsyncpa [#allocation3 + $0x1], 1 }

</bundles_post_ra>
